<compile_context>
chip_gen: v7x
topology: tpu7x:2x2x1
jax: 0.10.0
libtpu: 0.0.40
codegen_flags: <defaults>
</compile_context>

<pallas_src>
import math

import jax
import jax.numpy as jnp
from jax import lax
from jax.experimental import pallas as pl
from jax.experimental.pallas import tpu as pltpu


def _lightglue_kernel(d0_ref, d1_ref,
                      wq_ref, bq_ref,
                      wkv_ref, bkv_ref,
                      wp_ref, bp_ref,
                      out_ref):
    # d0_ref: (1, N0, D), d1_ref: (1, N1, D)
    # wq_ref : (D, D)   pre-transposed          -> q = d0 @ wq_ref + bq
    # wkv_ref: (D, 2D)  pre-transposed & fused  -> [k | v] = d1 @ wkv_ref + bkv
    # wp_ref : (D, D)   pre-transposed
    d0 = d0_ref[0]                                    # (N0, D)
    d1 = d1_ref[0]                                    # (N1, D)
    D = d0.shape[-1]

    # Q linear (desc0) and fused K/V linear (desc1) — one wide matmul for K/V.
    q = jnp.dot(d0, wq_ref[...], preferred_element_type=jnp.float32) + bq_ref[...]
    kv = jnp.dot(d1, wkv_ref[...], preferred_element_type=jnp.float32) + bkv_ref[...]
    k = kv[:, :D]                                     # (N1, D)
    v = kv[:, D:]                                     # (N1, D)

    # attn = q @ k^T / sqrt(D): contract last dims directly, no transpose of k.
    attn = lax.dot_general(q, k, (((1,), (1,)), ((), ())),
                           preferred_element_type=jnp.float32)
    attn = attn * (1.0 / math.sqrt(D))                # (N0, N1)

    # Softmax over keys — f32 VPU/EUP math, approximate reciprocal on the EUP.
    attn_max = jnp.max(attn, axis=-1, keepdims=True)
    p = jnp.exp(attn - attn_max)
    denom = jnp.sum(p, axis=-1, keepdims=True)
    weights = p * pl.reciprocal(denom, approx=True)   # (N0, N1)

    # out = softmax(attn) @ v, then the output projection.
    out = jnp.dot(weights, v, preferred_element_type=jnp.float32)        # (N0, D)
    proj = jnp.dot(out, wp_ref[...], preferred_element_type=jnp.float32) + bp_ref[...]

    out_ref[0] = proj.astype(out_ref.dtype)


def lightglue_forward(desc0, desc1, params):
    """desc0: (B, N0, D), desc1: (B, N1, D) -> (B, N0, D)"""
    B, N0, D = desc0.shape
    _, N1, _ = desc1.shape

    # Wrapper-side layout plumbing (runs once, outside the kernel):
    #   * transpose weights so the kernel computes x @ W_t
    #   * fuse the K and V weights/biases along the output-feature dim
    wq_t = params["wq"].T                                              # (D, D)
    wkv_t = jnp.concatenate([params["wk"].T, params["wv"].T], axis=1)  # (D, 2D)
    wp_t = params["wp"].T                                              # (D, D)
    bq = params["bq"].reshape(1, D)
    bkv = jnp.concatenate([params["bk"], params["bv"]]).reshape(1, 2 * D)
    bp = params["bp"].reshape(1, D)

    batch_spec0 = pl.BlockSpec((1, N0, D), lambda b: (b, 0, 0))
    batch_spec1 = pl.BlockSpec((1, N1, D), lambda b: (b, 0, 0))
    # Constant index_maps: these tiles are DMA'd for the first grid step only
    # and stay resident in VMEM for the rest of the batch loop.
    w_spec = pl.BlockSpec((D, D), lambda b: (0, 0))
    wkv_spec = pl.BlockSpec((D, 2 * D), lambda b: (0, 0))
    b_spec = pl.BlockSpec((1, D), lambda b: (0, 0))
    bkv_spec = pl.BlockSpec((1, 2 * D), lambda b: (0, 0))

    flops = 2 * B * (N0 * D * D            # Q linear
                     + N1 * D * 2 * D      # fused K/V linear
                     + N0 * N1 * D         # q @ k^T
                     + N0 * N1 * D         # weights @ v
                     + N0 * D * D)         # output projection
    bytes_accessed = 4 * (B * N0 * D + B * N1 * D      # descriptors in
                          + 4 * D * D + 4 * D          # weights / biases
                          + B * N0 * D)                # output
    cost = pl.CostEstimate(flops=flops,
                           transcendentals=B * N0 * N1,  # exp in softmax
                           bytes_accessed=bytes_accessed)

    return pl.pallas_call(
        _lightglue_kernel,
        out_shape=jax.ShapeDtypeStruct((B, N0, D), desc0.dtype),
        grid=(B,),
        in_specs=[
            batch_spec0, batch_spec1,
            w_spec, b_spec,
            wkv_spec, bkv_spec,
            w_spec, b_spec,
        ],
        out_specs=batch_spec0,
        compiler_params=pltpu.CompilerParams(
            dimension_semantics=("parallel",)),
        cost_estimate=cost,
    )(desc0, desc1, wq_t, bq, wkv_t, bkv, wp_t, bp)


def _reference_forward(desc0, desc1, params):
    """Pure-JAX reference replicating the PyTorch forward."""
    def lin(x, w, b):
        return x @ w.T + b
    q = lin(desc0, params["wq"], params["bq"])
    k = lin(desc1, params["wk"], params["bk"])
    v = lin(desc1, params["wv"], params["bv"])
    attn = jnp.einsum("bnd,bmd->bnm", q, k) / math.sqrt(q.shape[-1])
    weights = jax.nn.softmax(attn, axis=-1)
    out = jnp.einsum("bnm,bmd->bnd", weights, v)
    return lin(out, params["wp"], params["bp"])


def make_params(key, input_dim):
    """Deterministic synthetic parameters (shapes from nn.Linear(D, D))."""
    keys = jax.random.split(key, 8)
    scale = 1.0 / math.sqrt(input_dim)
    def w(k): return jax.random.uniform(k, (input_dim, input_dim),
                                        jnp.float32, -scale, scale)
    def b(k): return jax.random.uniform(k, (input_dim,),
                                        jnp.float32, -scale, scale)
    return {
        "wq": w(keys[0]), "bq": b(keys[1]),
        "wk": w(keys[2]), "bk": b(keys[3]),
        "wv": w(keys[4]), "bv": b(keys[5]),
        "wp": w(keys[6]), "bp": b(keys[7]),
    }


if __name__ == "__main__":
    # Module default hidden dim D=256 (lane-dense output); small keypoint
    # counts and batch keep the demo tiny.
    B, N0, N1, D = 2, 128, 128, 256
    key = jax.random.PRNGKey(0)
    k0, k1, kp = jax.random.split(key, 3)

    desc0 = jax.random.normal(k0, (B, N0, D), jnp.float32)
    desc1 = jax.random.normal(k1, (B, N1, D), jnp.float32)
    params = make_params(kp, D)

    out = jax.block_until_ready(lightglue_forward(desc0, desc1, params))
    ref = jax.block_until_ready(_reference_forward(desc0, desc1, params))

    assert out.shape == (B, N0, D)
    # Slightly looser than pure-f32 because the kernel uses the EUP
    # approximate reciprocal for the softmax denominator.
    assert jnp.allclose(out, ref, atol=1e-3, rtol=1e-3), "mismatch vs reference"
    print("KERNEL_OK")
</pallas_src>

<mosaic_0001>
module attributes {stable_mosaic.version = 11 : i64} {
  func.func @_lightglue_kernel(%arg0: i32, %arg1: memref<1x128x256xf32, #tpu.memory_space<vmem>>, %arg2: memref<1x128x256xf32, #tpu.memory_space<vmem>>, %arg3: memref<256x256xf32, #tpu.memory_space<vmem>>, %arg4: memref<1x256xf32, #tpu.memory_space<vmem>>, %arg5: memref<256x512xf32, #tpu.memory_space<vmem>>, %arg6: memref<1x512xf32, #tpu.memory_space<vmem>>, %arg7: memref<256x256xf32, #tpu.memory_space<vmem>>, %arg8: memref<1x256xf32, #tpu.memory_space<vmem>>, %arg9: memref<1x128x256xf32, #tpu.memory_space<vmem>>) attributes {dimension_semantics = [#tpu.dimension_semantics<parallel>], iteration_bounds = array<i64: 2>, scalar_prefetch = 0 : i64, scratch_operands = 0 : i64, tpu.core_type = #tpu.core_type<tc>, window_params = [{transform_indices = @transform_0, window_bounds = array<i64: 1, 128, 256>}, {transform_indices = @transform_1, window_bounds = array<i64: 1, 128, 256>}, {pipeline_mode = #tpu.pipeline_mode<synchronous>, transform_indices = @transform_2, window_bounds = array<i64: 256, 256>}, {pipeline_mode = #tpu.pipeline_mode<synchronous>, transform_indices = @transform_3, window_bounds = array<i64: 1, 256>}, {pipeline_mode = #tpu.pipeline_mode<synchronous>, transform_indices = @transform_4, window_bounds = array<i64: 256, 512>}, {pipeline_mode = #tpu.pipeline_mode<synchronous>, transform_indices = @transform_5, window_bounds = array<i64: 1, 512>}, {pipeline_mode = #tpu.pipeline_mode<synchronous>, transform_indices = @transform_6, window_bounds = array<i64: 256, 256>}, {pipeline_mode = #tpu.pipeline_mode<synchronous>, transform_indices = @transform_7, window_bounds = array<i64: 1, 256>}, {transform_indices = @transform_8, window_bounds = array<i64: 1, 128, 256>}]} {
    %c0 = arith.constant 0 : index
    %c0_0 = arith.constant 0 : index
    %c0_1 = arith.constant 0 : index
    %0 = vector.load %arg1[%c0, %c0_0, %c0_1] : memref<1x128x256xf32, #tpu.memory_space<vmem>>, vector<1x128x256xf32>
    %1 = vector.shape_cast %0 : vector<1x128x256xf32> to vector<128x256xf32>
    %c0_2 = arith.constant 0 : index
    %c0_3 = arith.constant 0 : index
    %c0_4 = arith.constant 0 : index
    %2 = vector.load %arg2[%c0_2, %c0_3, %c0_4] : memref<1x128x256xf32, #tpu.memory_space<vmem>>, vector<1x128x256xf32>
    %3 = vector.shape_cast %2 : vector<1x128x256xf32> to vector<128x256xf32>
    %c0_5 = arith.constant 0 : index
    %c0_6 = arith.constant 0 : index
    %4 = vector.load %arg3[%c0_5, %c0_6] : memref<256x256xf32, #tpu.memory_space<vmem>>, vector<256x256xf32>
    %cst = arith.constant dense<0.000000e+00> : vector<128x256xf32>
    %5 = tpu.matmul %1, %4, %cst {dimension_numbers = #tpu.dot_dimension_numbers<[1], [0], [0], [1], [0, 0, 1, 1], [], []>} : vector<128x256xf32>, vector<256x256xf32>, vector<128x256xf32> -> vector<128x256xf32>
    %c0_7 = arith.constant 0 : index
    %c0_8 = arith.constant 0 : index
    %6 = vector.load %arg4[%c0_7, %c0_8] : memref<1x256xf32, #tpu.memory_space<vmem>>, vector<1x256xf32>
    %7 = vector.broadcast %6 : vector<1x256xf32> to vector<128x256xf32>
    %8 = arith.addf %5, %7 : vector<128x256xf32>
    %c0_9 = arith.constant 0 : index
    %c0_10 = arith.constant 0 : index
    %9 = vector.load %arg5[%c0_9, %c0_10] : memref<256x512xf32, #tpu.memory_space<vmem>>, vector<256x512xf32>
    %cst_11 = arith.constant dense<0.000000e+00> : vector<128x512xf32>
    %10 = tpu.matmul %3, %9, %cst_11 {dimension_numbers = #tpu.dot_dimension_numbers<[1], [0], [0], [1], [0, 0, 1, 1], [], []>} : vector<128x256xf32>, vector<256x512xf32>, vector<128x512xf32> -> vector<128x512xf32>
    %c0_12 = arith.constant 0 : index
    %c0_13 = arith.constant 0 : index
    %11 = vector.load %arg6[%c0_12, %c0_13] : memref<1x512xf32, #tpu.memory_space<vmem>>, vector<1x512xf32>
    %12 = vector.broadcast %11 : vector<1x512xf32> to vector<128x512xf32>
    %13 = arith.addf %10, %12 : vector<128x512xf32>
    %14 = vector.extract_strided_slice %13 {offsets = [0, 0], sizes = [128, 256], strides = [1, 1]} : vector<128x512xf32> to vector<128x256xf32>
    %15 = vector.extract_strided_slice %13 {offsets = [0, 256], sizes = [128, 256], strides = [1, 1]} : vector<128x512xf32> to vector<128x256xf32>
    %cst_14 = arith.constant dense<0.000000e+00> : vector<128x128xf32>
    %16 = tpu.matmul %8, %14, %cst_14 {dimension_numbers = #tpu.dot_dimension_numbers<[1], [1], [0], [0], [0, 0, 1, 0], [], []>} : vector<128x256xf32>, vector<128x256xf32>, vector<128x128xf32> -> vector<128x128xf32>
    %cst_15 = arith.constant 6.250000e-02 : f32
    %17 = vector.broadcast %cst_15 : f32 to vector<128x128xf32>
    %18 = arith.mulf %16, %17 : vector<128x128xf32>
    %cst_16 = arith.constant dense<0xFF800000> : vector<128xf32>
    %19 = vector.multi_reduction <maximumf>, %18, %cst_16 [1] : vector<128x128xf32> to vector<128xf32>
    %20 = vector.shape_cast %19 : vector<128xf32> to vector<128x1xf32>
    %21 = vector.broadcast %20 : vector<128x1xf32> to vector<128x128xf32>
    %22 = arith.subf %18, %21 : vector<128x128xf32>
    %23 = math.exp %22 : vector<128x128xf32>
    %cst_17 = arith.constant dense<0.000000e+00> : vector<128xf32>
    %24 = vector.multi_reduction <add>, %23, %cst_17 [1] : vector<128x128xf32> to vector<128xf32>
    %25 = vector.shape_cast %24 : vector<128xf32> to vector<128x1xf32>
    %26 = tpu.reciprocal %25 {approx = true} : vector<128x1xf32> -> vector<128x1xf32>
    %27 = vector.broadcast %26 : vector<128x1xf32> to vector<128x128xf32>
    %28 = arith.mulf %23, %27 : vector<128x128xf32>
    %cst_18 = arith.constant dense<0.000000e+00> : vector<128x256xf32>
    %29 = tpu.matmul %28, %15, %cst_18 {dimension_numbers = #tpu.dot_dimension_numbers<[1], [0], [0], [1], [0, 0, 1, 1], [], []>} : vector<128x128xf32>, vector<128x256xf32>, vector<128x256xf32> -> vector<128x256xf32>
    %c0_19 = arith.constant 0 : index
    %c0_20 = arith.constant 0 : index
    %30 = vector.load %arg7[%c0_19, %c0_20] : memref<256x256xf32, #tpu.memory_space<vmem>>, vector<256x256xf32>
    %cst_21 = arith.constant dense<0.000000e+00> : vector<128x256xf32>
    %31 = tpu.matmul %29, %30, %cst_21 {dimension_numbers = #tpu.dot_dimension_numbers<[1], [0], [0], [1], [0, 0, 1, 1], [], []>} : vector<128x256xf32>, vector<256x256xf32>, vector<128x256xf32> -> vector<128x256xf32>
    %c0_22 = arith.constant 0 : index
    %c0_23 = arith.constant 0 : index
    %32 = vector.load %arg8[%c0_22, %c0_23] : memref<1x256xf32, #tpu.memory_space<vmem>>, vector<1x256xf32>
    %33 = vector.broadcast %32 : vector<1x256xf32> to vector<128x256xf32>
    %34 = arith.addf %31, %33 : vector<128x256xf32>
    %c0_24 = arith.constant 0 : index
    %c0_25 = arith.constant 0 : index
    %c0_26 = arith.constant 0 : index
    %35 = vector.load %arg9[%c0_24, %c0_25, %c0_26] : memref<1x128x256xf32, #tpu.memory_space<vmem>>, vector<1x128x256xf32>
    %36 = vector.shape_cast %35 : vector<1x128x256xf32> to vector<128x256xf32>
    %37 = vector.shape_cast %34 : vector<128x256xf32> to vector<1x128x256xf32>
    tpu.vector_store %arg9[%c0_24, %c0_25, %c0_26], %37 {strides = array<i32>} : memref<1x128x256xf32, #tpu.memory_space<vmem>>, vector<1x128x256xf32>,
    return
  }
  func.func @transform_0(%arg0: i32) -> (i32, i32, i32) {
    %c0_i32 = arith.constant 0 : i32
    %c0_i32_0 = arith.constant 0 : i32
    %c0_i32_1 = arith.constant 0 : i32
    return %arg0, %c0_i32, %c0_i32_0 : i32, i32, i32
  }
  func.func @transform_1(%arg0: i32) -> (i32, i32, i32) {
    %c0_i32 = arith.constant 0 : i32
    %c0_i32_0 = arith.constant 0 : i32
    %c0_i32_1 = arith.constant 0 : i32
    return %arg0, %c0_i32, %c0_i32_0 : i32, i32, i32
  }
  func.func @transform_2(%arg0: i32) -> (i32, i32) {
    %c0_i32 = arith.constant 0 : i32
    %c0_i32_0 = arith.constant 0 : i32
    %c0_i32_1 = arith.constant 0 : i32
    return %c0_i32, %c0_i32_0 : i32, i32
  }
  func.func @transform_3(%arg0: i32) -> (i32, i32) {
    %c0_i32 = arith.constant 0 : i32
    %c0_i32_0 = arith.constant 0 : i32
    %c0_i32_1 = arith.constant 0 : i32
    return %c0_i32, %c0_i32_0 : i32, i32
  }
  func.func @transform_4(%arg0: i32) -> (i32, i32) {
    %c0_i32 = arith.constant 0 : i32
    %c0_i32_0 = arith.constant 0 : i32
    %c0_i32_1 = arith.constant 0 : i32
    return %c0_i32, %c0_i32_0 : i32, i32
  }
  func.func @transform_5(%arg0: i32) -> (i32, i32) {
    %c0_i32 = arith.constant 0 : i32
    %c0_i32_0 = arith.constant 0 : i32
    %c0_i32_1 = arith.constant 0 : i32
    return %c0_i32, %c0_i32_0 : i32, i32
  }
  func.func @transform_6(%arg0: i32) -> (i32, i32) {
    %c0_i32 = arith.constant 0 : i32
    %c0_i32_0 = arith.constant 0 : i32
    %c0_i32_1 = arith.constant 0 : i32
    return %c0_i32, %c0_i32_0 : i32, i32
  }
  func.func @transform_7(%arg0: i32) -> (i32, i32) {
    %c0_i32 = arith.constant 0 : i32
    %c0_i32_0 = arith.constant 0 : i32
    %c0_i32_1 = arith.constant 0 : i32
    return %c0_i32, %c0_i32_0 : i32, i32
  }
  func.func @transform_8(%arg0: i32) -> (i32, i32, i32) {
    %c0_i32 = arith.constant 0 : i32
    %c0_i32_0 = arith.constant 0 : i32
    %c0_i32_1 = arith.constant 0 : i32
    return %arg0, %c0_i32, %c0_i32_0 : i32, i32, i32
  }
}

</mosaic_0001>

<bundles_post_ra>
// kernel: tpu_custom_call.1
= control target key start
LH: loop header
LB: loop body
LE: loop exit
PB: predicated region body
PF: predicated region fallthrough
CT: control target
= control target key end

     0   :  { %s3756_s0 = inlined_call_operand.hbm [shape: f32[2,128,256], index: 0, kind: input, shape index: {}]   ;;  %s3757_s1 = inlined_call_operand.hbm [shape: f32[2,128,256], index: 1, kind: input, shape index: {}]   ;;  %s3758_s2 = inlined_call_operand.hbm [shape: f32[256,256], index: 2, kind: input, shape index: {}]   ;;  %s3759_s3 = inlined_call_operand.vmem [shape: f32[1,256], index: 3, kind: input, shape index: {}]   ;;  %s3760_s4 = inlined_call_operand.hbm [shape: f32[256,512], index: 4, kind: input, shape index: {}]   ;;  %s3761_s5 = inlined_call_operand.vmem [shape: f32[1,512], index: 5, kind: input, shape index: {}]   ;;  %s3762_s6 = inlined_call_operand.hbm [shape: f32[256,256], index: 6, kind: input, shape index: {}]   ;;  %s3763_s7 = inlined_call_operand.vmem [shape: f32[1,256], index: 7, kind: input, shape index: {}]   ;;  %s3764_s8 = inlined_call_operand.hbm [shape: f32[2,128,256], index: 8, kind: output, shape index: {}]  }
   0x1   :  { %3786 = sst [smem:[#allocation30_spill]] %s3758_s2 }
   0x2   :  { %3787 = sst [smem:[#allocation31_spill]] %s3760_s4 }
   0x3   :  { %3788 = sst [smem:[#allocation32_spill]] %s3762_s6 }
   0x4   :  { %13 = vsyncpa [#allocation3], 0 }
   0x5   :  { %15 = vsyncpa [#allocation3 + $0x1], 0 }
   0x6   :  { %16 = vsyncpa [#allocation6], 0 }
   0x7   :  { %18 = vsyncpa [#allocation6 + $0x1], 0 }
   0x8   :  { %19 = vsyncpa [#allocation9], 0 }
   0x9   :  { %20 = vsyncpa [#allocation4], 0 }
   0xa   :  { %22 = vsyncpa [#allocation4 + $0x1], 0  ;;  %s2835_s27 = smov 0   ;;  %s2837_s28 = smov 0  }
   0xb   :  { %s2839_s29 = smov 0   ;;  %s2841_s30 = smov 0  }
   0xc LB: > { %3789 = sst [smem:[#allocation17_spill]] %s2763_s27  ;;  %s2856_s9 = sadd.s32 4294967295, %s2775_s30   ;;  %s2775_s30 = sphi %s2841_s30, %s3838_s30   ;;  %s2771_s29 = sphi %s2839_s29, %s3835_s29   ;;  %s2767_s28 = sphi %s2837_s28, %s3837_s28   ;;  %s2763_s27 = sphi %s2835_s27, %s3836_s27  }
   0xd   : > { %3790 = sst [smem:[#allocation18_spill]] %s2771_s29  ;;  %s2053_s10 = sadd.s32 4294967294, %s2775_s30  }
   0xe   : > { %p48_p0 = scmp.ne.s32.totalorder %s2767_s28, %s2763_s27  ;;  %p3765_p1 = scmp.eq.s32.totalorder %s2856_s9, 0 }
   0xf   : > { %p230_p3 = scmp.eq.s32.totalorder %s2053_s10, 1  ;;  %p2054_p5 = scmp.ge.s32.totalorder %s2775_s30, 1 }
  0x10   : > { %p2865_p4 = por %p3765_p1, %p48_p0  ;;  %p237_p7 = scmp.lt.s32.totalorder %s2775_s30, 3 }
  0x11   : > { %p2870_p6 = por %p230_p3, %p48_p0  ;;  %s2777_s14 = smov [#allocation7]  }
  0x12   : > { %s3791_s11 = scalar_select %p2865_p4, 1, 0 }
  0x13   : > { %s3792_s12 = scalar_select %p2870_p6, 1, 0 }
  0x14   : > { %p2875_p8 = pnand %p2054_p5, %p237_p7  ;;  %s249_s15 = sshll.u32 %s2777_s14, 4  ;;  %s2879_s15 = int_to_ptr.vmem [resolvable:$true] %s249_s15 }
  0x15   : > { %3793 = sst [smem:[#allocation19_spill]] %s3792_s12  ;;  %s2778_s17 = smov [#allocation8]  }
  0x16   : > { %s3794_s13 = scalar_select %p2875_p8, 1, 0 }
  0x17   : > { %p2418_p9 = pneg %p2875_p8  ;;  %s265_s18 = sshll.u32 %s2778_s17, 4  ;;  %s2890_s18 = int_to_ptr.vmem [resolvable:$true] %s265_s18 }
  0x18   : > { %s3796_s2 = sld [smem:[#allocation30_spill]] }
  0x19   : > { %p2886_p11 = pnand %p2418_p9, %p3765_p1 }
  0x1b   : > { %p2900_p13 = pneg %p2886_p11 }
  0x1e   : > { %s2553_s21 = scalar_lea.hbm %s3796_s2, 8192 }
  0x1f   : > { %p2554_p12 = scmp.ne.s32.totalorder %s3796_s2, %s2553_s21  ;;  %p2560_p5 = scmp.lt.u32.totalorder %s2553_s21, %s3796_s2 }
  0x21   : > { %p2556_p0 = pnand %p2900_p13, %p2554_p12 }
  0x23   : > { %p2557_p3 = pneg %p2556_p0 }
  0x25   : > { %p2562_p7 = pnand %p2560_p5, %p2557_p3 }
  0x27   : > { %2565 = shalt.err (!%p2562_p7)
}
  0x28   : > { %s2566_s10 = scalar_lea.vmem %s2879_s15, 8192  ;;  %p2574_p2 = scmp.lt.s32.totalorder %s2879_s15, %s2879_s15 }
  0x29   : > { %p2567_p9 = scmp.ne.s32.totalorder %s2879_s15, %s2566_s10  ;;  %p2575_p6 = scmp.lt.s32.totalorder %s2566_s10, %s2566_s10 }
  0x2b   : > { %p2569_p10 = pnand %p2567_p9, %p2900_p13  ;;  %p2576_p12 = por %p2575_p6, %p2574_p2 }
  0x2d   : > { %p2570_p1 = pneg %p2569_p10 }
  0x2f   : > { %p2577_p0 = pnand %p2576_p12, %p2570_p1 }
  0x31   : > { %2580 = shalt.err (!%p2577_p0)
}
  0x32   : > { %s3767_s14 = smov 256   ;;  %s3769_s17 = smov 16  }
  0x33   : > { %2421 = dma.hbm_to_vmem [thread:$0]  (!%p2886_p11), %s3796_s2, 8192, %s2879_s15, [#allocation6], %s3767_s14, %s3767_s14, %s3769_s17  }
  0x34   : > { %s3798_s4 = sld [smem:[#allocation31_spill]] }
  0x3a   : > { %s2581_s23 = scalar_lea.hbm %s3798_s4, 16384 }
  0x3b   : > { %p2582_p1 = scmp.ne.s32.totalorder %s3798_s4, %s2581_s23  ;;  %p2588_p10 = scmp.lt.u32.totalorder %s2581_s23, %s3798_s4 }
  0x3d   : > { %p2584_p2 = pnand %p2582_p1, %p2900_p13 }
  0x3f   : > { %p2585_p6 = pneg %p2584_p2 }
  0x41   : > { %p2590_p3 = pnand %p2588_p10, %p2585_p6 }
  0x43   : > { %2593 = shalt.err (!%p2590_p3)
}
  0x44   : > { %s2594_s15 = scalar_lea.vmem %s2890_s18, 16384  ;;  %p2602_p12 = scmp.lt.s32.totalorder %s2890_s18, %s2890_s18 }
  0x45   : > { %p2595_p5 = scmp.ne.s32.totalorder %s2890_s18, %s2594_s15  ;;  %p2603_p0 = scmp.lt.s32.totalorder %s2594_s15, %s2594_s15 }
  0x47   : > { %p2597_p7 = pnand %p2595_p5, %p2900_p13  ;;  %p2604_p1 = por %p2603_p0, %p2602_p12 }
  0x49   : > { %p2598_p9 = pneg %p2597_p7 }
  0x4b   : > { %p2605_p2 = pnand %p2604_p1, %p2598_p9 }
  0x4d   : > { %2608 = shalt.err (!%p2605_p2)
}
  0x4e   : > { %s2781_s19 = smov 512   ;;  %s2782_s12 = smov 32  }
  0x4f   : > { %2424 = dma.hbm_to_vmem [thread:$0]  (!%p2886_p11), %s3798_s4, 16384, %s2890_s18, [#allocation9], %s2781_s19, %s2781_s19, %s2782_s12  }
  0x50   : > { %s2783_s22 = smov [#allocation10]   ;;  %s2948_s25 = sadd.s32 1, %s2775_s30  }
  0x51   : > { %s281_s23 = sshll.u32 %s2783_s22, 4  ;;  %s3799_s6 = sld [smem:[#allocation32_spill]]  ;;  %s282_s23 = int_to_ptr.vmem [resolvable:$true] %s281_s23 }
  0x57   : > { %s2609_s15 = scalar_lea.hbm %s3799_s6, 8192 }
  0x58   : > { %p2610_p6 = scmp.ne.s32.totalorder %s3799_s6, %s2609_s15  ;;  %p2616_p5 = scmp.lt.u32.totalorder %s2609_s15, %s3799_s6 }
  0x5a   : > { %p2612_p10 = pnand %p2610_p6, %p2900_p13 }
  0x5c   : > { %p2613_p3 = pneg %p2612_p10 }
  0x5e   : > { %p2618_p7 = pnand %p2616_p5, %p2613_p3 }
  0x60   : > { %2621 = shalt.err (!%p2618_p7)
}
  0x61   : > { %s2622_s18 = scalar_lea.vmem %s282_s23, 8192  ;;  %p2630_p1 = scmp.lt.s32.totalorder %s282_s23, %s282_s23 }
  0x62   : > { %p2623_p9 = scmp.ne.s32.totalorder %s282_s23, %s2622_s18  ;;  %p2631_p2 = scmp.lt.s32.totalorder %s2622_s18, %s2622_s18 }
  0x64   : > { %p2625_p12 = pnand %p2623_p9, %p2900_p13  ;;  %p2632_p4 = por %p2631_p2, %p2630_p1 }
  0x66   : > { %p2626_p0 = pneg %p2625_p12 }
  0x68   : > { %p2633_p8 = pnand %p2632_p4, %p2626_p0 }
  0x6a   : > { %2636 = shalt.err (!%p2633_p8)
}
  0x6b   : > { %s3800_s14 = smov 16   ;;  %s3801_s17 = smov 256  }
  0x6c   : > { %2427 = dma.hbm_to_vmem [thread:$0]  (!%p2886_p11), %s3799_s6, 8192, %s282_s23, [#allocation9], %s3801_s17, %s3801_s17, %s3800_s14  }
  0x6d   : > { %s32_s24 = ssub.s32 %s2775_s30, %s2948_s25  ;;  %s35_s16 = sadd.s32 1, %s2771_s29 }
  0x6e   : > { %p33_p4 = scmp.eq.s32.totalorder %s32_s24, 0  ;;  %p42_p8 = scmp.ne.s32.totalorder %s2771_s29, %s2767_s28 }
  0x6f   : > { %p43_p13 = scmp.eq.s32.totalorder %s2775_s30, 0  ;;  %p2442_p6 = scmp.lt.s32.totalorder %s2775_s30, 2 }
  0x70   : > { %s2979_s19 = scalar_select %p33_p4, %s2771_s29, %s35_s16  }
  0x71   : > { %p44_p10 = por %p43_p13, %p42_p8  ;;  %p3803_p3 = scmp.eq.s32.totalorder %s2856_s9, 1 }
  0x72   : > { %3802 = sst [smem:[#allocation20_spill]] %s2979_s19  ;;  %s298_s20 = sand.u32 1, %s2771_s29  }
  0x73   : > { %p2983_p5 = por %p3803_p3, %p42_p8  ;;  %s2077_s21 = sshll.u32 %s2775_s30, 12 }
  0x74   : > { %s2989_s22 = sshll.u32 %s298_s20, 8  ;;  %s2994_s10 = scalar_lea.hbm %s3756_s0, %s2077_s21 }
  0x75   : > { %s302_s15 = scalar_lea.vmem [#allocation2], %s2989_s22  ;;  %p2997_p11 = pnand %p2442_p6, %p44_p10 }
  0x76   : > { %s309_s18 = sshll.u32 %s302_s15, 4  ;;  %s3006_s16 = scalar_lea.hbm %s3757_s1, %s2077_s21  ;;  %s3001_s18 = int_to_ptr.vmem [resolvable:$true] %s309_s18 }
  0x77   : > { %s3008_s26 = scalar_lea.sflag [#allocation3], %s298_s20  ;;  %s2637_s23 = scalar_lea.hbm %s2994_s10, 4096 }
  0x78   : > { %p2638_p7 = scmp.ne.s32.totalorder %s2994_s10, %s2637_s23  ;;  %p2639_p9 = pneg %p2997_p11 }
  0x79   : > { %s2642_s6 = scalar_lea.hbm %s3756_s0, 8192  ;;  %p2643_p1 = scmp.lt.u32.totalorder %s2994_s10, %s3756_s0 }
  0x7a   : > { %p2640_p12 = pnand %p2639_p9, %p2638_p7  ;;  %p2644_p2 = scmp.lt.u32.totalorder %s2642_s6, %s2637_s23 }
  0x7b   : > { %p2646_p8 = scmp.lt.u32.totalorder %s2637_s23, %s2994_s10 }
  0x7c   : > { %p2641_p0 = pneg %p2640_p12  ;;  %p2645_p4 = por %p2644_p2, %p2643_p1 }
  0x7e   : > { %p2647_p13 = por %p2646_p8, %p2645_p4 }
  0x80   : > { %p2648_p6 = pnand %p2647_p13, %p2641_p0 }
  0x82   : > { %2651 = shalt.err (!%p2648_p6)
}
  0x83   : > { %s2652_s20 = scalar_lea.vmem %s3001_s18, 4096  ;;  %s2784_s4 = smov [#allocation2]  }
  0x84   : > { %p2653_p10 = scmp.ne.s32.totalorder %s3001_s18, %s2652_s20  ;;  %s2657_s21 = sshll.u32 %s2784_s4, 4  ;;  %s2658_s21 = int_to_ptr.vmem [resolvable:$false] %s2657_s21 }
  0x85   : > { %s2659_s29 = scalar_lea.vmem %s2658_s21, 8192  ;;  %p2660_p12 = scmp.lt.s32.totalorder %s3001_s18, %s2658_s21 }
  0x86   : > { %p2655_p3 = pnand %p2653_p10, %p2639_p9  ;;  %p2661_p1 = scmp.lt.s32.totalorder %s2659_s29, %s2652_s20 }
  0x88   : > { %p2656_p7 = pneg %p2655_p3  ;;  %p2662_p2 = por %p2661_p1, %p2660_p12 }
  0x8a   : > { %p2663_p4 = pnand %p2662_p2, %p2656_p7 }
  0x8c   : > { %2666 = shalt.err (!%p2663_p4)
}
  0x8d   : > { %2431 = dma.hbm_to_vmem [thread:$0]  (!%p2997_p11), %s2994_s10, 4096, %s3001_s18, %s3008_s26, %s3801_s17, %s3801_s17, %s3800_s14  }
  0x8e   : > { %s323_s6 = scalar_lea.vmem [#allocation5], %s2989_s22  ;;  %s319_s27 = sand.u32 1, %s2775_s30  }
  0x8f   : > { %s330_s19 = sshll.u32 %s323_s6, 4  ;;  %s3043_s24 = scalar_lea.sflag [#allocation6], %s319_s27  ;;  %s3041_s19 = int_to_ptr.vmem [resolvable:$true] %s330_s19 }
  0x90   : > { %s2667_s23 = scalar_lea.hbm %s3006_s16, 4096  ;;  %s2672_s4 = scalar_lea.hbm %s3757_s1, 8192 }
  0x91   : > { %p2668_p0 = scmp.ne.s32.totalorder %s3006_s16, %s2667_s23  ;;  %p2673_p6 = scmp.lt.u32.totalorder %s3006_s16, %s3757_s1 }
  0x92   : > { %p2674_p10 = scmp.lt.u32.totalorder %s2672_s4, %s2667_s23  ;;  %p2676_p7 = scmp.lt.u32.totalorder %s2667_s23, %s3006_s16 }
  0x93   : > { %p2670_p8 = pnand %p2668_p0, %p2639_p9 }
  0x94   : > { %p2675_p3 = por %p2674_p10, %p2673_p6 }
  0x95   : > { %p2671_p13 = pneg %p2670_p8 }
  0x96   : > { %p2677_p12 = por %p2676_p7, %p2675_p3 }
  0x98   : > { %p2678_p1 = pnand %p2677_p12, %p2671_p13 }
  0x9a   : > { %2681 = shalt.err (!%p2678_p1)
}
  0x9b   : > { %s2682_s22 = scalar_lea.vmem %s3041_s19, 4096  ;;  %s2785_s10 = smov [#allocation5]  }
  0x9c   : > { %p2683_p2 = scmp.ne.s32.totalorder %s3041_s19, %s2682_s22  ;;  %s2687_s18 = sshll.u32 %s2785_s10, 4  ;;  %s2688_s18 = int_to_ptr.vmem [resolvable:$false] %s2687_s18 }
  0x9d   : > { %s2689_s26 = scalar_lea.vmem %s2688_s18, 8192  ;;  %p2690_p8 = scmp.lt.s32.totalorder %s3041_s19, %s2688_s18 }
  0x9e   : > { %p2685_p4 = pnand %p2683_p2, %p2639_p9  ;;  %p2691_p6 = scmp.lt.s32.totalorder %s2689_s26, %s2682_s22 }
  0xa0   : > { %p2686_p0 = pneg %p2685_p4  ;;  %p2692_p10 = por %p2691_p6, %p2690_p8 }
  0xa2   : > { %p2693_p3 = pnand %p2692_p10, %p2686_p0 }
  0xa4   : > { %2696 = shalt.err (!%p2693_p3)
}
  0xa5   : > { %2434 = dma.hbm_to_vmem [thread:$0]  (!%p2997_p11), %s3006_s16, 4096, %s3041_s19, %s3043_s24, %s3801_s17, %s3801_s17, %s3800_s14  }
  0xa6   : > { %p3806_p9 = scmp.ne.s32.totalorder %s3794_s13, 0 }
  0xa8   : > { %342 = sbr.rel (%p3806_p9) target bundleno = 1572 (0x624), region = 52 }
  0xaf   : > { %s3075_s6 = sand.u32 1, %s2767_s28   ;;  %p3807_p13 = scmp.ne.s32.totalorder %s3791_s11, 0 }
  0xb0   : > { %s3078_s27 = sshll.u32 %s3075_s6, 8  ;;  %s345_s2 = scalar_lea.sflag [#allocation3], %s3075_s6 }
  0xb1   : > { %s3082_s23 = scalar_lea.vmem [#allocation2], %s3078_s27 }
  0xb2   : > { %2742 = dma.done.wait (%p3807_p13), %s345_s2, 4096  }
  0xb3   : > { %2744 = vsyncadd (%p3807_p13), %s345_s2, 4294963200  ;;  %s353_s13 = sand.u32 1, %s2856_s9   ;;  %s3090_s17 = scalar_lea.vmem [#allocation5], %s3078_s27 }
  0xb4   : > { %s354_s14 = scalar_lea.sflag [#allocation6], %s353_s13 }
  0xb5   : > { %2746 = dma.done.wait (%p3807_p13), %s354_s14, 4096  }
  0xb6   : > { %2748 = vsyncadd (%p3807_p13), %s354_s14, 4294963200  ;;  %p3808_p11 = scmp.eq.s32.totalorder %s2856_s9, 0 }
  0xb8   : > { %2750 = dma.done.wait (%p3808_p11), [#allocation6], 8192   ;;  %p3809_p7 = pmov %p3808_p11 }
  0xba   : > { %2752 = vsyncadd (%p3809_p7), [#allocation6], 4294959104  ;;  %p3810_p12 = pmov %p3809_p7 }
  0xbb   : > { %p3811_p1 = pmov %p3809_p7 }
  0xbc   : > { %2754 = dma.done.wait (%p3810_p12), [#allocation9], 24576  }
  0xbd   : > { %2756 = vsyncadd (%p3811_p1), [#allocation9], 4294942720  ;;  %v709_v0 = vld [vmem:[#allocation8 + $0x8] sm:$0xff]  ;;  %v708_v2 = vld [vmem:[#allocation8] sm:$0xff]  ;;  %s3641_s4 = scalar_lea.vmem [#allocation11], %s3078_s27  ;;  %s2079_s21 = sshll.u32 %s2856_s9, 12 }
  0xbe   : > { %v713_v1 = vld [vmem:[#allocation8 + $0x28] sm:$0xff]  ;;  %v712_v4 = vld [vmem:[#allocation8 + $0x20] sm:$0xff]  ;;  %v474_v45 = vld [vmem:[#allocation7 + $0x18] sm:$0xff]  ;;  %s1929_s29 = sshll.u32 %s3641_s4, 4  ;;  %s3707_s18 = scalar_lea.hbm %s3764_s8, %s2079_s21  ;;  %s3709_s29 = int_to_ptr.vmem [resolvable:$true] %s1929_s29 }
  0xbf   : > { %v2144_v3 = vpack.c.bf16 %v713_v1, %v709_v0  ;;  %v717_v5 = vld [vmem:[#allocation8 + $0x48] sm:$0xff]  ;;  %v2146_v7 = vpack.c.bf16 %v712_v4, %v708_v2  ;;  %v716_v9 = vld [vmem:[#allocation8 + $0x40] sm:$0xff]  ;;  %v473_v47 = vld [vmem:[#allocation7 + $0x10] sm:$0xff]  ;;  %s1916_s9 = scalar_lea.sflag [#allocation4], %s3075_s6  ;;  %s2697_s26 = scalar_lea.vmem %s3709_s29, 4096 }
  0xc0   : > { %v721_v6 = vld [vmem:[#allocation8 + $0x68] sm:$0xff]  ;;  %v720_v10 = vld [vmem:[#allocation8 + $0x60] sm:$0xff]  ;;  %v478_v55 = vld [vmem:[#allocation7 + $0x38] sm:$0xff]  ;;  %p2698_p2 = scmp.ne.s32.totalorder %s3709_s29, %s2697_s26  ;;  %s2787_s27 = smov [#allocation11]  }
  0xc1   : > { %v2148_v8 = vpack.c.bf16 %v721_v6, %v717_v5  ;;  %v725_v11 = vld [vmem:[#allocation8 + $0x88] sm:$0xff]  ;;  %2145 = vmatprep.subr.bf16.mxu1 %v2144_v3  ;;  %v2150_v13 = vpack.c.bf16 %v720_v10, %v716_v9  ;;  %v724_v15 = vld [vmem:[#allocation8 + $0x80] sm:$0xff]  ;;  %v477_v57 = vld [vmem:[#allocation7 + $0x30] sm:$0xff]  ;;  %s2701_s2 = sshll.u32 %s2787_s27, 4  ;;  %s2702_s2 = int_to_ptr.vmem [resolvable:$false] %s2701_s2 }
  0xc2   : > { %v729_v12 = vld [vmem:[#allocation8 + $0xa8] sm:$0xff]  ;;  %2147 = vmatpush1.bf16.msra.mxu1 %v2146_v7  ;;  %v728_v16 = vld [vmem:[#allocation8 + $0xa0] sm:$0xff]  ;;  %v482_v63 = vld [vmem:[#allocation7 + $0x58] sm:$0xff]  ;;  %p2699_p4 = pnand %p2698_p2, %p2983_p5  ;;  %p2704_p8 = scmp.lt.s32.totalorder %s3709_s29, %s2702_s2 }
  0xc3   : > { %2149 = vmatprep.subr.bf16.mxu1 %v2148_v8  ;;  %v2152_v14 = vpack.c.bf16 %v729_v12, %v725_v11  ;;  %v733_v17 = vld [vmem:[#allocation8 + $0xc8] sm:$0xff]  ;;  %v2154_v19 = vpack.c.bf16 %v728_v16, %v724_v15  ;;  %v732_v21 = vld [vmem:[#allocation8 + $0xc0] sm:$0xff]  ;;  %v481_v4 = vld [vmem:[#allocation7 + $0x50] sm:$0xff] }
  0xc4   : > { %v737_v18 = vld [vmem:[#allocation8 + $0xe8] sm:$0xff]  ;;  %v736_v22 = vld [vmem:[#allocation8 + $0xe0] sm:$0xff]  ;;  %v486_v8 = vld [vmem:[#allocation7 + $0x78] sm:$0xff]  ;;  %p2700_p0 = pneg %p2699_p4 }
  0xc5   : > { %v2156_v20 = vpack.c.bf16 %v737_v18, %v733_v17  ;;  %v741_v23 = vld [vmem:[#allocation8 + $0x108] sm:$0xff]  ;;  %v2158_v25 = vpack.c.bf16 %v736_v22, %v732_v21  ;;  %v740_v27 = vld [vmem:[#allocation8 + $0x100] sm:$0xff]  ;;  %v485_v16 = vld [vmem:[#allocation7 + $0x70] sm:$0xff] }
  0xc6   : > { %2151 = vmatpush1.bf16.msra.mxu1 %v2150_v13  ;;  %v745_v24 = vld [vmem:[#allocation8 + $0x128] sm:$0xff]  ;;  %v744_v28 = vld [vmem:[#allocation8 + $0x120] sm:$0xff] }
  0xc7   : > { %2153 = vmatprep.subr.bf16.mxu1 %v2152_v14  ;;  %v2160_v26 = vpack.c.bf16 %v745_v24, %v741_v23  ;;  %v749_v29 = vld [vmem:[#allocation8 + $0x148] sm:$0xff]  ;;  %v2162_v31 = vpack.c.bf16 %v744_v28, %v740_v27  ;;  %v748_v33 = vld [vmem:[#allocation8 + $0x140] sm:$0xff]  ;;  %v489_v28 = vld [vmem:[#allocation7 + $0x90] sm:$0xff] }
  0xc8   : > { %v753_v30 = vld [vmem:[#allocation8 + $0x168] sm:$0xff]  ;;  %v752_v34 = vld [vmem:[#allocation8 + $0x160] sm:$0xff] }
  0xc9   : > { %v2164_v32 = vpack.c.bf16 %v753_v30, %v749_v29  ;;  %v757_v35 = vld [vmem:[#allocation8 + $0x188] sm:$0xff]  ;;  %v2166_v37 = vpack.c.bf16 %v752_v34, %v748_v33  ;;  %v756_v39 = vld [vmem:[#allocation8 + $0x180] sm:$0xff] }
  0xca   : > { %2155 = vmatpush1.bf16.msra.mxu1 %v2154_v19  ;;  %v761_v36 = vld [vmem:[#allocation8 + $0x1a8] sm:$0xff]  ;;  %v760_v40 = vld [vmem:[#allocation8 + $0x1a0] sm:$0xff] }
  0xcb   : > { %2157 = vmatprep.subr.bf16.mxu1 %v2156_v20  ;;  %v2168_v38 = vpack.c.bf16 %v761_v36, %v757_v35  ;;  %v3105_v41 = vld [vmem:[%s3090_s17 + $0x8] sm:$0xff]  ;;  %v471_v46 = vld [vmem:[#allocation7] sm:$0xff]  ;;  %v2170_v48 = vpack.c.bf16 %v760_v40, %v756_v39  ;;  %v490_v20 = vld [vmem:[#allocation7 + $0x98] sm:$0xff] }
  0xcc   : > { %v765_v42 = vld [vmem:[#allocation8 + $0x1c8] sm:$0xff]  ;;  %922 = vmatprep.mubr.f32.mxu1 %v3105_v41  ;;  %v764_v49 = vld [vmem:[#allocation8 + $0x1c0] sm:$0xff]  ;;  %v2082_v52 = vpack.c.bf16 %v473_v47, %v471_v46  ;;  %v493_v40 = vld [vmem:[#allocation7 + $0xb0] sm:$0xff] }
  0xcd   : > { %v769_v43 = vld [vmem:[#allocation8 + $0x1e8] sm:$0xff]  ;;  %v768_v50 = vld [vmem:[#allocation8 + $0x1e0] sm:$0xff] }
  0xce   : > { %2159 = vmatpush1.bf16.msra.mxu1 %v2158_v25  ;;  %v472_v44 = vld [vmem:[#allocation7 + $0x8] sm:$0xff]  ;;  %v2172_v54 = vpack.c.bf16 %v769_v43, %v765_v42  ;;  %v475_v56 = vld [vmem:[#allocation7 + $0x20] sm:$0xff]  ;;  %v2174_v0 = vpack.c.bf16 %v768_v50, %v764_v49 }
  0xcf   : > { %2161 = vmatprep.subr.bf16.mxu1 %v2160_v26  ;;  %v2080_v51 = vpack.c.bf16 %v474_v45, %v472_v44  ;;  %v476_v53 = vld [vmem:[#allocation7 + $0x28] sm:$0xff]  ;;  %v2086_v62 = vpack.c.bf16 %v477_v57, %v475_v56  ;;  %v772_v1 = vld [vmem:[#allocation8 + $0x200] sm:$0xff]  ;;  %v498_v45 = vld [vmem:[#allocation7 + $0xd8] sm:$0xff] }
  0xd0   : > { %v773_v58 = vld [vmem:[#allocation8 + $0x208] sm:$0xff]  ;;  %v2084_v60 = vpack.c.bf16 %v478_v55, %v476_v53  ;;  %v479_v3 = vld [vmem:[#allocation7 + $0x40] sm:$0xff]  ;;  %v497_v53 = vld [vmem:[#allocation7 + $0xd0] sm:$0xff] }
  0xd1   : > { %v777_v59 = vld [vmem:[#allocation8 + $0x228] sm:$0xff]  ;;  %2081 = vmatprep.subr.bf16.mxu0 %v2080_v51  ;;  %v776_v6 = vld [vmem:[#allocation8 + $0x220] sm:$0xff]  ;;  %v2090_v11 = vpack.c.bf16 %v481_v4, %v479_v3  ;;  %v502_v57 = vld [vmem:[#allocation7 + $0xf8] sm:$0xff] }
  0xd2   : > { %2163 = vmatpush1.bf16.msra.mxu1 %v2162_v31  ;;  %v480_v61 = vld [vmem:[#allocation7 + $0x48] sm:$0xff]  ;;  %2083 = vmatpush1.bf16.msra.mxu0 %v2082_v52  ;;  %v2176_v5 = vpack.c.bf16 %v777_v59, %v773_v58  ;;  %v2178_v12 = vpack.c.bf16 %v776_v6, %v772_v1  ;;  %v780_v13 = vld [vmem:[#allocation8 + $0x240] sm:$0xff]  ;;  %v501_v1 = vld [vmem:[#allocation7 + $0xf0] sm:$0xff] }
  0xd3   : > { %2165 = vmatprep.subr.bf16.mxu1 %v2164_v32  ;;  %2085 = vmatprep.subr.bf16.mxu0 %v2084_v60  ;;  %v2088_v2 = vpack.c.bf16 %v482_v63, %v480_v61  ;;  %v484_v7 = vld [vmem:[#allocation7 + $0x68] sm:$0xff]  ;;  %v483_v15 = vld [vmem:[#allocation7 + $0x60] sm:$0xff]  ;;  %v494_v32 = vld [vmem:[#allocation7 + $0xb8] sm:$0xff] }
  0xd4   : > { %v781_v9 = vld [vmem:[#allocation8 + $0x248] sm:$0xff]  ;;  %v2092_v14 = vpack.c.bf16 %v486_v8, %v484_v7  ;;  %v784_v18 = vld [vmem:[#allocation8 + $0x260] sm:$0xff]  ;;  %v2094_v23 = vpack.c.bf16 %v485_v16, %v483_v15 }
  0xd5   : > { %v785_v10 = vld [vmem:[#allocation8 + $0x268] sm:$0xff]  ;;  %v2182_v24 = vpack.c.bf16 %v784_v18, %v780_v13  ;;  %v788_v25 = vld [vmem:[#allocation8 + $0x280] sm:$0xff] }
  0xd6   : > { %2167 = vmatpush1.bf16.msra.mxu1 %v2166_v37  ;;  %2087 = vmatpush1.bf16.msra.mxu0 %v2086_v62  ;;  %v2180_v17 = vpack.c.bf16 %v785_v10, %v781_v9  ;;  %v488_v19 = vld [vmem:[#allocation7 + $0x88] sm:$0xff]  ;;  %v487_v27 = vld [vmem:[#allocation7 + $0x80] sm:$0xff] }
  0xd7   : > { %2169 = vmatprep.subr.bf16.mxu1 %v2168_v38  ;;  %2089 = vmatprep.subr.bf16.mxu0 %v2088_v2  ;;  %v789_v21 = vld [vmem:[#allocation8 + $0x288] sm:$0xff]  ;;  %v2096_v26 = vpack.c.bf16 %v490_v20, %v488_v19  ;;  %v792_v30 = vld [vmem:[#allocation8 + $0x2a0] sm:$0xff]  ;;  %v2098_v35 = vpack.c.bf16 %v489_v28, %v487_v27 }
  0xd8   : > { %v793_v22 = vld [vmem:[#allocation8 + $0x2a8] sm:$0xff]  ;;  %v2186_v36 = vpack.c.bf16 %v792_v30, %v788_v25  ;;  %v796_v37 = vld [vmem:[#allocation8 + $0x2c0] sm:$0xff]  ;;  %v514_v30 = vld [vmem:[#allocation7 + $0x158] sm:$0xff] }
  0xd9   : > { %v2184_v29 = vpack.c.bf16 %v793_v22, %v789_v21  ;;  %v492_v31 = vld [vmem:[#allocation7 + $0xa8] sm:$0xff]  ;;  %v491_v39 = vld [vmem:[#allocation7 + $0xa0] sm:$0xff] }
  0xda   : > { %2171 = vmatpush1.bf16.msra.mxu1 %v2170_v48  ;;  %2091 = vmatpush1.bf16.msra.mxu0 %v2090_v11  ;;  %v797_v33 = vld [vmem:[#allocation8 + $0x2c8] sm:$0xff]  ;;  %v2100_v38 = vpack.c.bf16 %v494_v32, %v492_v31  ;;  %v800_v43 = vld [vmem:[#allocation8 + $0x2e0] sm:$0xff]  ;;  %v2102_v48 = vpack.c.bf16 %v493_v40, %v491_v39 }
  0xdb   : > { %2173 = vmatprep.subr.bf16.mxu1 %v2172_v54  ;;  %2093 = vmatprep.subr.bf16.mxu0 %v2092_v14  ;;  %v801_v34 = vld [vmem:[#allocation8 + $0x2e8] sm:$0xff]  ;;  %v2190_v49 = vpack.c.bf16 %v800_v43, %v796_v37  ;;  %v804_v50 = vld [vmem:[#allocation8 + $0x300] sm:$0xff]  ;;  %v505_v14 = vld [vmem:[#allocation7 + $0x110] sm:$0xff] }
  0xdc   : > { %v2188_v42 = vpack.c.bf16 %v801_v34, %v797_v33  ;;  %v496_v44 = vld [vmem:[#allocation7 + $0xc8] sm:$0xff]  ;;  %v495_v52 = vld [vmem:[#allocation7 + $0xc0] sm:$0xff]  ;;  %v518_v37 = vld [vmem:[#allocation7 + $0x178] sm:$0xff] }
  0xdd   : > { %v805_v46 = vld [vmem:[#allocation8 + $0x308] sm:$0xff]  ;;  %v2104_v51 = vpack.c.bf16 %v498_v45, %v496_v44  ;;  %v808_v55 = vld [vmem:[#allocation8 + $0x320] sm:$0xff]  ;;  %v2106_v60 = vpack.c.bf16 %v497_v53, %v495_v52  ;;  %v517_v43 = vld [vmem:[#allocation7 + $0x170] sm:$0xff] }
  0xde   : > { %2175 = vmatpush1.bf16.msra.mxu1 %v2174_v0  ;;  %2095 = vmatpush1.bf16.msra.mxu0 %v2094_v23  ;;  %v809_v47 = vld [vmem:[#allocation8 + $0x328] sm:$0xff]  ;;  %v2194_v61 = vpack.c.bf16 %v808_v55, %v804_v50  ;;  %v812_v62 = vld [vmem:[#allocation8 + $0x340] sm:$0xff]  ;;  %v3113_v44 = vld [vmem:[%s3090_s17 + $0x18] sm:$0xff] }
  0xdf   : > { %2177 = vmatprep.subr.bf16.mxu1 %v2176_v5  ;;  %2097 = vmatprep.subr.bf16.mxu0 %v2096_v26  ;;  %v2192_v54 = vpack.c.bf16 %v809_v47, %v805_v46  ;;  %v500_v56 = vld [vmem:[#allocation7 + $0xe8] sm:$0xff]  ;;  %v499_v0 = vld [vmem:[#allocation7 + $0xe0] sm:$0xff]  ;;  %v506_v5 = vld [vmem:[#allocation7 + $0x118] sm:$0xff] }
  0xe0   : > { %v813_v58 = vld [vmem:[#allocation8 + $0x348] sm:$0xff]  ;;  %v2108_v63 = vpack.c.bf16 %v502_v57, %v500_v56  ;;  %v816_v3 = vld [vmem:[#allocation8 + $0x360] sm:$0xff]  ;;  %v2110_v9 = vpack.c.bf16 %v501_v1, %v499_v0  ;;  %v509_v26 = vld [vmem:[#allocation7 + $0x130] sm:$0xff] }
  0xe1   : > { %v817_v59 = vld [vmem:[#allocation8 + $0x368] sm:$0xff]  ;;  %v820_v8 = vld [vmem:[#allocation8 + $0x380] sm:$0xff]  ;;  %v2198_v10 = vpack.c.bf16 %v816_v3, %v812_v62  ;;  %v522_v46 = vld [vmem:[#allocation7 + $0x198] sm:$0xff] }
  0xe2   : > { %2179 = vmatpush1.bf16.msra.mxu1 %v2178_v12  ;;  %2099 = vmatpush1.bf16.msra.mxu0 %v2098_v35  ;;  %v2196_v2 = vpack.c.bf16 %v817_v59, %v813_v58  ;;  %v504_v4 = vld [vmem:[#allocation7 + $0x108] sm:$0xff]  ;;  %v824_v11 = vld [vmem:[#allocation8 + $0x3a0] sm:$0xff]  ;;  %v513_v35 = vld [vmem:[#allocation7 + $0x150] sm:$0xff] }
  0xe3   : > { %2181 = vmatprep.subr.bf16.mxu1 %v2180_v17  ;;  %2101 = vmatprep.subr.bf16.mxu0 %v2100_v38  ;;  %v821_v6 = vld [vmem:[#allocation8 + $0x388] sm:$0xff]  ;;  %v2112_v12 = vpack.c.bf16 %v506_v5, %v504_v4  ;;  %v503_v13 = vld [vmem:[#allocation7 + $0x100] sm:$0xff]  ;;  %v510_v17 = vld [vmem:[#allocation7 + $0x138] sm:$0xff]  ;;  %v2202_v22 = vpack.c.bf16 %v824_v11, %v820_v8 }
  0xe4   : > { %v825_v7 = vld [vmem:[#allocation8 + $0x3a8] sm:$0xff]  ;;  %v2114_v21 = vpack.c.bf16 %v505_v14, %v503_v13  ;;  %v828_v23 = vld [vmem:[#allocation8 + $0x3c0] sm:$0xff]  ;;  %v525_v59 = vld [vmem:[#allocation7 + $0x1b0] sm:$0xff] }
  0xe5   : > { %v2200_v15 = vpack.c.bf16 %v825_v7, %v821_v6  ;;  %v508_v16 = vld [vmem:[#allocation7 + $0x128] sm:$0xff]  ;;  %v507_v25 = vld [vmem:[#allocation7 + $0x120] sm:$0xff]  ;;  %v530_v62 = vld [vmem:[#allocation7 + $0x1d8] sm:$0xff] }
  0xe6   : > { %2183 = vmatpush1.bf16.msra.mxu1 %v2182_v24  ;;  %2103 = vmatpush1.bf16.msra.mxu0 %v2102_v48  ;;  %v408_v18 = vld [vmem:[%s3082_s23 + $0x8] sm:$0xff]  ;;  %v2116_v24 = vpack.c.bf16 %v510_v17, %v508_v16  ;;  %v832_v28 = vld [vmem:[#allocation8 + $0x3e0] sm:$0xff]  ;;  %v2118_v31 = vpack.c.bf16 %v509_v26, %v507_v25  ;;  %v3118_v48 = vld [vmem:[%s3090_s17 + $0x10] sm:$0xff] }
  0xe7   : > { %2185 = vmatprep.subr.bf16.mxu1 %v2184_v29  ;;  %2105 = vmatprep.subr.bf16.mxu0 %v2104_v51  ;;  %v829_v19 = vld [vmem:[#allocation8 + $0x3c8] sm:$0xff]  ;;  %v2206_v32 = vpack.c.bf16 %v832_v28, %v828_v23  ;;  %v511_v34 = vld [vmem:[#allocation7 + $0x140] sm:$0xff]  ;;  %v521_v51 = vld [vmem:[#allocation7 + $0x190] sm:$0xff] }
  0xe8   : > { %v833_v20 = vld [vmem:[#allocation8 + $0x3e8] sm:$0xff]  ;;  %611 = vmatprep.mubr.f32.mxu0 %v408_v18  ;;  %v2122_v38 = vpack.c.bf16 %v513_v35, %v511_v34  ;;  %v3110_v39 = vld [vmem:[%s3090_s17] sm:$0xff]  ;;  %v3134_v0 = vld [vmem:[%s3090_s17 + $0x30] sm:$0xff] }
  0xe9   : > { %v2204_v27 = vpack.c.bf16 %v833_v20, %v829_v19  ;;  %v512_v29 = vld [vmem:[#allocation7 + $0x148] sm:$0xff]  ;;  %v519_v50 = vld [vmem:[#allocation7 + $0x180] sm:$0xff]  ;;  %v529_v3 = vld [vmem:[#allocation7 + $0x1d0] sm:$0xff] }
  0xea   : > { %2187 = vmatpush1.bf16.msra.mxu1 %v2186_v36  ;;  %2107 = vmatpush1.bf16.msra.mxu0 %v2106_v60  ;;  %v2120_v33 = vpack.c.bf16 %v514_v30, %v512_v29  ;;  %v516_v36 = vld [vmem:[#allocation7 + $0x168] sm:$0xff]  ;;  %v2130_v55 = vpack.c.bf16 %v521_v51, %v519_v50  ;;  %v3126_v56 = vld [vmem:[%s3090_s17 + $0x20] sm:$0xff]  ;;  %v3129_v60 = vld [vmem:[%s3090_s17 + $0x38] sm:$0xff] }
  0xeb   : > { %2189 = vmatprep.subr.bf16.mxu1 %v2188_v42  ;;  %2109 = vmatprep.subr.bf16.mxu0 %v2108_v63  ;;  %v2124_v40 = vpack.c.bf16 %v518_v37, %v516_v36  ;;  %v515_v42 = vld [vmem:[#allocation7 + $0x160] sm:$0xff]  ;;  %v520_v45 = vld [vmem:[#allocation7 + $0x188] sm:$0xff]  ;;  %v534_v6 = vld [vmem:[#allocation7 + $0x1f8] sm:$0xff] }
  0xec   : > { %v2126_v47 = vpack.c.bf16 %v517_v43, %v515_v42  ;;  %v3121_v52 = vld [vmem:[%s3090_s17 + $0x28] sm:$0xff]  ;;  %v523_v58 = vld [vmem:[#allocation7 + $0x1a0] sm:$0xff]  ;;  %v533_v11 = vld [vmem:[#allocation7 + $0x1f0] sm:$0xff] }
  0xed   : > { %v524_v53 = vld [vmem:[#allocation7 + $0x1a8] sm:$0xff]  ;;  %v2134_v63 = vpack.c.bf16 %v525_v59, %v523_v58  ;;  %v3142_v8 = vld [vmem:[%s3090_s17 + $0x40] sm:$0xff]  ;;  %v3150_v14 = vld [vmem:[%s3090_s17 + $0x50] sm:$0xff] }
  0xee   : > { %2191 = vmatpush1.bf16.msra.mxu1 %v2190_v49  ;;  %2111 = vmatpush1.bf16.msra.mxu0 %v2110_v9  ;;  %v2128_v49 = vpack.c.bf16 %v522_v46, %v520_v45  ;;  %v3137_v4 = vld [vmem:[%s3090_s17 + $0x48] sm:$0xff]  ;;  %v407_v16 = vld [vmem:[%s3082_s23] sm:$0xff]  ;;  %v410_v18 = vld [vmem:[%s3082_s23 + $0x18] sm:$0xff] }
  0xef   : > { %2193 = vmatprep.subr.bf16.mxu1 %v2192_v54  ;;  %2113 = vmatprep.subr.bf16.mxu0 %v2112_v12  ;;  %v526_v54 = vld [vmem:[#allocation7 + $0x1b8] sm:$0xff]  ;;  %v532_v5 = vld [vmem:[#allocation7 + $0x1e8] sm:$0xff]  ;;  %v3159_v17 = vld [vmem:[%s3090_s17 + $0x60] sm:$0xff] }
  0xf0   : > { %v2132_v57 = vpack.c.bf16 %v526_v54, %v524_v53  ;;  %v2140_v9 = vpack.c.bf16 %v534_v6, %v532_v5  ;;  %v3145_v12 = vld [vmem:[%s3090_s17 + $0x58] sm:$0xff]  ;;  %v409_v20 = vld [vmem:[%s3082_s23 + $0x10] sm:$0xff]  ;;  %v3173_v23 = vld [vmem:[%s3090_s17 + $0x88] sm:$0xff] }
  0xf1   : > { %v3163_v19 = vld [vmem:[%s3090_s17 + $0x78] sm:$0xff]  ;;  %v3179_v25 = vld [vmem:[%s3090_s17 + $0x80] sm:$0xff]  ;;  %v413_v28 = vld [vmem:[%s3082_s23 + $0x30] sm:$0xff] }
  0xf2   : > { %2195 = vmatpush1.bf16.msra.mxu1 %v2194_v61  ;;  %2115 = vmatpush1.bf16.msra.mxu0 %v2114_v21  ;;  %v528_v61 = vld [vmem:[#allocation7 + $0x1c8] sm:$0xff]  ;;  %v3169_v21 = vld [vmem:[%s3090_s17 + $0x70] sm:$0xff]  ;;  %v414_v26 = vld [vmem:[%s3082_s23 + $0x38] sm:$0xff] }
  0xf3   : > { %2197 = vmatprep.subr.bf16.mxu1 %v2196_v2  ;;  %2117 = vmatprep.subr.bf16.mxu0 %v2116_v24  ;;  %v2136_v1 = vpack.c.bf16 %v530_v62, %v528_v61  ;;  %v527_v2 = vld [vmem:[#allocation7 + $0x1c0] sm:$0xff]  ;;  %v3189_v29 = vld [vmem:[%s3090_s17 + $0x90] sm:$0xff]  ;;  %v416_v30 = vld [vmem:[%s3082_s23 + $0x48] sm:$0xff] }
  0xf4   : > { %v2138_v7 = vpack.c.bf16 %v529_v3, %v527_v2  ;;  %v411_v24 = vld [vmem:[%s3082_s23 + $0x20] sm:$0xff]  ;;  %v418_v34 = vld [vmem:[%s3082_s23 + $0x58] sm:$0xff]  ;;  %v417_v36 = vld [vmem:[%s3082_s23 + $0x50] sm:$0xff] }
  0xf5   : > { %v3203_v35 = vld [vmem:[%s3090_s17 + $0xb8] sm:$0xff]  ;;  %v3209_v37 = vld [vmem:[%s3090_s17 + $0xb0] sm:$0xff]  ;;  %v419_v42 = vld [vmem:[%s3082_s23 + $0x60] sm:$0xff] }
  0xf6   : > { %2199 = vmatpush1.bf16.msra.mxu1 %v2198_v10  ;;  %2119 = vmatpush1.bf16.msra.mxu0 %v2118_v31  ;;  %v531_v10 = vld [vmem:[#allocation7 + $0x1e0] sm:$0xff]  ;;  %v3193_v31 = vld [vmem:[%s3090_s17 + $0xa8] sm:$0xff]  ;;  %v422_v45 = vld [vmem:[%s3082_s23 + $0x78] sm:$0xff] }
  0xf7   : > { %2201 = vmatprep.subr.bf16.mxu1 %v2200_v15  ;;  %2121 = vmatprep.subr.bf16.mxu0 %v2120_v33  ;;  %v2142_v13 = vpack.c.bf16 %v533_v11, %v531_v10  ;;  %v3153_v15 = vld [vmem:[%s3090_s17 + $0x68] sm:$0xff]  ;;  %v3199_v33 = vld [vmem:[%s3090_s17 + $0xa0] sm:$0xff]  ;;  %v3223_v46 = vld [vmem:[%s3090_s17 + $0xd8] sm:$0xff] }
  0xf8   : > { %v3219_v43 = vld [vmem:[%s3090_s17 + $0xc0] sm:$0xff]  ;;  %3812 = vst [vmem:[#allocation21_spill] sm:$0xff] %v3223_v46  ;;  %v424_v50 = vld [vmem:[%s3082_s23 + $0x88] sm:$0xff]  ;;  %v425_v58 = vld [vmem:[%s3082_s23 + $0x90] sm:$0xff] }
  0xf9   : > { %v3233_v51 = vld [vmem:[%s3090_s17 + $0xe8] sm:$0xff]  ;;  %v423_v53 = vld [vmem:[%s3082_s23 + $0x80] sm:$0xff]  ;;  %v3249_v59 = vld [vmem:[%s3090_s17 + $0xf0] sm:$0xff] }
  0xfa   : > { %2203 = vmatpush1.bf16.msra.mxu1 %v2202_v22  ;;  %2123 = vmatpush1.bf16.msra.mxu0 %v2122_v38  ;;  %v412_v22 = vld [vmem:[%s3082_s23 + $0x28] sm:$0xff]  ;;  %3814 = vst [vmem:[#allocation23_spill] sm:$0xff] %v3233_v51  ;;  %v3239_v54 = vld [vmem:[%s3090_s17 + $0xe0] sm:$0xff]  ;;  %3817 = vst [vmem:[#allocation26_spill] sm:$0xff] %v3249_v59 }
  0xfb   : > { %2205 = vmatprep.subr.bf16.mxu1 %v2204_v27  ;;  %2125 = vmatprep.subr.bf16.mxu0 %v2124_v40  ;;  %v3183_v27 = vld [vmem:[%s3090_s17 + $0x98] sm:$0xff]  ;;  %v420_v38 = vld [vmem:[%s3082_s23 + $0x68] sm:$0xff]  ;;  %3815 = vst [vmem:[#allocation24_spill] sm:$0xff] %v3239_v54  ;;  %v427_v62 = vld [vmem:[%s3082_s23 + $0xa0] sm:$0xff] }
  0xfc   : > { %v3213_v40 = vld [vmem:[%s3090_s17 + $0xc8] sm:$0xff]  ;;  %v431_v3 = vld [vmem:[%s3082_s23 + $0xc0] sm:$0xff]  ;;  %v434_v5 = vld [vmem:[%s3082_s23 + $0xd8] sm:$0xff] }
  0xfd   : > { %v428_v61 = vld [vmem:[%s3082_s23 + $0xa8] sm:$0xff]  ;;  %v433_v6 = vld [vmem:[%s3082_s23 + $0xd0] sm:$0xff]  ;;  %v438_v10 = vld [vmem:[%s3082_s23 + $0xf8] sm:$0xff] }
  0xfe   : > { %2207 = vmatpush1.bf16.msra.mxu1 %v2206_v32  ;;  %2127 = vmatpush1.bf16.msra.mxu0 %v2126_v47  ;;  %v415_v32 = vld [vmem:[%s3082_s23 + $0x40] sm:$0xff]  ;;  %v421_v47 = vld [vmem:[%s3082_s23 + $0x70] sm:$0xff]  ;;  %v432_v2 = vld [vmem:[%s3082_s23 + $0xc8] sm:$0xff] }
  0xff   : > { %2129 = vmatprep.subr.bf16.mxu0 %v2128_v49  ;;  %v3229_v49 = vld [vmem:[%s3090_s17 + $0xd0] sm:$0xff] }
 0x100   : > { %3813 = vst [vmem:[#allocation22_spill] sm:$0xff] %v3229_v49  ;;  %v437_v11 = vld [vmem:[%s3082_s23 + $0xf0] sm:$0xff] }
 0x101   : > { %923 = vmatmul.mubr.f32.vlgmr.msra.gmra.mrb[0].mxu1 %v3110_v39 }
 0x102   : > { %928 = vmatprep.mubr.f32.mxu1 %v3113_v44  ;;  %2131 = vmatpush1.bf16.msra.mxu0 %v2130_v55  ;;  %v426_v55 = vld [vmem:[%s3082_s23 + $0x98] sm:$0xff] }
 0x103   : > { %2133 = vmatprep.subr.bf16.mxu0 %v2132_v57  ;;  %v3243_v57 = vld [vmem:[%s3090_s17 + $0xf8] sm:$0xff] }
 0x104   : > { %3816 = vst [vmem:[#allocation25_spill] sm:$0xff] %v3243_v57 }
 0x105   : > { %929 = vmatmul.mubr.f32.gmra.mrb[2].mxu1 %v3118_v48 }
 0x106   : > { %934 = vmatprep.mubr.f32.mxu1 %v3121_v52  ;;  %2135 = vmatpush1.bf16.msra.mxu0 %v2134_v63  ;;  %v430_v63 = vld [vmem:[%s3082_s23 + $0xb8] sm:$0xff] }
 0x107   : > { %2137 = vmatprep.subr.bf16.mxu0 %v2136_v1  ;;  %v429_v1 = vld [vmem:[%s3082_s23 + $0xb0] sm:$0xff] }
 0x109   : > { %935 = vmatmul.mubr.f32.gmra.mrb[4].mxu1 %v3126_v56 }
 0x10a   : > { %940 = vmatprep.mubr.f32.mxu1 %v3129_v60  ;;  %2139 = vmatpush1.bf16.msra.mxu0 %v2138_v7  ;;  %v436_v7 = vld [vmem:[%s3082_s23 + $0xe8] sm:$0xff] }
 0x10b   : > { %2141 = vmatprep.subr.bf16.mxu0 %v2140_v9  ;;  %v435_v9 = vld [vmem:[%s3082_s23 + $0xe0] sm:$0xff]  ;;  %s2703_s23 = scalar_lea.vmem %s2702_s2, 8192 }
 0x10c   : > { %p2705_p6 = scmp.lt.s32.totalorder %s2703_s23, %s2697_s26 }
 0x10d   : > { %941 = vmatmul.mubr.f32.gmra.mrb[6].mxu1 %v3134_v0 }
 0x10e   : > { %946 = vmatprep.mubr.f32.mxu1 %v3137_v4  ;;  %2143 = vmatpush1.bf16.msra.mxu0 %v2142_v13  ;;  %v537_v13 = vlaneseq  ;;  %p2706_p10 = por %p2705_p6, %p2704_p8 }
 0x110   : > { %p2707_p3 = pnand %p2706_p10, %p2700_p0 }
 0x111   : > { %947 = vmatmul.mubr.f32.gmra.mrb[8].mxu1 %v3142_v8  ;;  %612 = vmatmul.mubr.f32.vlgmr.msra.gmra.mrb[0].mxu0 %v407_v16  ;;  %v3265_v16 = vshrl.u32 %v537_v13, 7 }
 0x112   : > { %952 = vmatprep.mubr.f32.mxu1 %v3145_v12  ;;  %617 = vmatprep.mubr.f32.mxu0 %v410_v18 }
 0x113   : > { %3818 = vst [vmem:[#allocation27_spill] sm:$0xff] %v3265_v16  ;;  %v3268_v18 = vsub.s32 0, %v3265_v16 }
 0x115   : > { %953 = vmatmul.mubr.f32.gmra.mrb[10].mxu1 %v3150_v14  ;;  %618 = vmatmul.mubr.f32.gmra.mrb[2].mxu0 %v409_v20  ;;  %v3273_v20 = vld [vmem:[%s3761_s5] sm:$0xf] }
 0x116   : > { %958 = vmatprep.mubr.f32.mxu1 %v3153_v15  ;;  %623 = vmatprep.mubr.f32.mxu0 %v412_v22  ;;  %3819 = vst [vmem:[#allocation28_spill] sm:$0xff] %v3273_v20  ;;  %v3276_v22 = vsub.s32 1, %v3265_v16 }
 0x118   : > { %3820 = vst [vmem:[#allocation29_spill] sm:$0xff] %v3276_v22 }
 0x119   : > { %959 = vmatmul.mubr.f32.gmra.mrb[12].mxu1 %v3159_v17  ;;  %624 = vmatmul.mubr.f32.gmra.mrb[4].mxu0 %v411_v24 }
 0x11a   : > { %964 = vmatprep.mubr.f32.mxu1 %v3163_v19  ;;  %629 = vmatprep.mubr.f32.mxu0 %v414_v26  ;;  %v3280_v26 = vrot.slane %v3273_v20, %v3268_v18 }
 0x11d   : > { %965 = vmatmul.mubr.f32.gmra.mrb[14].mxu1 %v3169_v21  ;;  %630 = vmatmul.mubr.f32.gmra.mrb[6].mxu0 %v413_v28  ;;  %v3284_v28 = vrot.slane %v3273_v20, %v3276_v22 }
 0x11e   : > { %970 = vmatprep.mubr.f32.mxu1 %v3173_v23  ;;  %635 = vmatprep.mubr.f32.mxu0 %v416_v30 }
 0x121   : > { %971 = vmatmul.mubr.f32.gmra.mrb[16].mxu1 %v3179_v25  ;;  %636 = vmatmul.mubr.f32.gmra.mrb[8].mxu0 %v415_v32 }
 0x122   : > { %976 = vmatprep.mubr.f32.mxu1 %v3183_v27  ;;  %641 = vmatprep.mubr.f32.mxu0 %v418_v34 }
 0x125   : > { %977 = vmatmul.mubr.f32.gmra.mrb[18].mxu1 %v3189_v29  ;;  %642 = vmatmul.mubr.f32.gmra.mrb[10].mxu0 %v417_v36 }
 0x126   : > { %982 = vmatprep.mubr.f32.mxu1 %v3193_v31  ;;  %647 = vmatprep.mubr.f32.mxu0 %v420_v38 }
 0x129   : > { %983 = vmatmul.mubr.f32.gmra.mrb[20].mxu1 %v3199_v33  ;;  %648 = vmatmul.mubr.f32.gmra.mrb[12].mxu0 %v419_v42 }
 0x12a   : > { %988 = vmatprep.mubr.f32.mxu1 %v3203_v35  ;;  %653 = vmatprep.mubr.f32.mxu0 %v422_v45  ;;  %v711_v45 = vld [vmem:[#allocation8 + $0x18] sm:$0xff] }
 0x12d   : > { %989 = vmatmul.mubr.f32.gmra.mrb[22].mxu1 %v3209_v37  ;;  %654 = vmatmul.mubr.f32.gmra.mrb[14].mxu0 %v421_v47  ;;  %v715_v47 = vld [vmem:[#allocation8 + $0x38] sm:$0xff] }
 0x12e   : > { %994 = vmatprep.mubr.f32.mxu1 %v3213_v40  ;;  %659 = vmatprep.mubr.f32.mxu0 %v424_v50  ;;  %v710_v50 = vld [vmem:[#allocation8 + $0x10] sm:$0xff] }
 0x131   : > { %995 = vmatmul.mubr.f32.gmra.mrb[24].mxu1 %v3219_v43  ;;  %660 = vmatmul.mubr.f32.gmra.mrb[16].mxu0 %v423_v53 }
 0x132   : > { %1000 = vmatprep.mubr.f32.mxu1 %v3223_v46  ;;  %665 = vmatprep.mubr.f32.mxu0 %v426_v55  ;;  %v2208_v55 = vpack.c.bf16 %v715_v47, %v711_v45 }
 0x134   : > { %2209 = vmatprep.subr.bf16.mxu0 %v2208_v55 }
 0x135   : > { %1001 = vmatmul.mubr.f32.gmra.mrb[26].mxu1 %v3229_v49  ;;  %666 = vmatmul.mubr.f32.gmra.mrb[18].mxu0 %v425_v58  ;;  %v714_v58 = vld [vmem:[#allocation8 + $0x30] sm:$0xff] }
 0x136   : > { %1006 = vmatprep.mubr.f32.mxu1 %v3233_v51  ;;  %671 = vmatprep.mubr.f32.mxu0 %v428_v61  ;;  %v719_v61 = vld [vmem:[#allocation8 + $0x58] sm:$0xff] }
 0x139   : > { %1007 = vmatmul.mubr.f32.gmra.mrb[28].mxu1 %v3239_v54  ;;  %672 = vmatmul.mubr.f32.gmra.mrb[20].mxu0 %v427_v62  ;;  %v723_v62 = vld [vmem:[#allocation8 + $0x78] sm:$0xff] }
 0x13a   : > { %1012 = vmatprep.mubr.f32.mxu1 %v3243_v57  ;;  %677 = vmatprep.mubr.f32.mxu0 %v430_v63 }
 0x13d   : > { %1013 = vmatmul.mubr.f32.gmra.mrb[30].mxu1 %v3249_v59  ;;  %678 = vmatmul.mubr.f32.gmra.mrb[22].mxu0 %v429_v1 }
 0x13e   : > { %683 = vmatprep.mubr.f32.mxu0 %v432_v2  ;;  %v2210_v2 = vpack.c.bf16 %v714_v58, %v710_v50  ;;  %v734_v58 = vld [vmem:[#allocation8 + $0xd0] sm:$0xff] }
 0x140   : > { %2211 = vmatpush1.bf16.msra.mxu0 %v2210_v2  ;;  %v743_v2 = vld [vmem:[#allocation8 + $0x118] sm:$0xff] }
 0x141   : > { %684 = vmatmul.mubr.f32.gmra.mrb[24].mxu0 %v431_v3  ;;  %v2212_v3 = vpack.c.bf16 %v723_v62, %v719_v61  ;;  %v738_v61 = vld [vmem:[#allocation8 + $0xf0] sm:$0xff] }
 0x142   : > { %689 = vmatprep.mubr.f32.mxu0 %v434_v5  ;;  %v718_v5 = vld [vmem:[#allocation8 + $0x50] sm:$0xff] }
 0x143   : > { %2213 = vmatprep.subr.bf16.mxu0 %v2212_v3  ;;  %v747_v3 = vld [vmem:[#allocation8 + $0x138] sm:$0xff] }
 0x145   : > { %690 = vmatmul.mubr.f32.gmra.mrb[26].mxu0 %v433_v6  ;;  %v722_v6 = vld [vmem:[#allocation8 + $0x70] sm:$0xff] }
 0x146   : > { %695 = vmatprep.mubr.f32.mxu0 %v436_v7  ;;  %v727_v7 = vld [vmem:[#allocation8 + $0x98] sm:$0xff] }
 0x149   : > { %696 = vmatmul.mubr.f32.gmra.mrb[28].mxu0 %v435_v9 }
 0x14a   : > { %701 = vmatprep.mubr.f32.mxu0 %v438_v10  ;;  %v731_v10 = vld [vmem:[#allocation8 + $0xb8] sm:$0xff] }
 0x14b   : > { %v2216_v13 = vpack.c.bf16 %v731_v10, %v727_v7  ;;  %v2224_v7 = vpack.c.bf16 %v747_v3, %v743_v2  ;;  %v746_v10 = vld [vmem:[#allocation8 + $0x130] sm:$0xff]  ;;  %v763_v2 = vld [vmem:[#allocation8 + $0x1b8] sm:$0xff] }
 0x14d   : > { %702 = vmatmul.mubr.f32.gmra.mrb[30].mxu0 %v437_v11  ;;  %v2214_v11 = vpack.c.bf16 %v722_v6, %v718_v5  ;;  %v2222_v6 = vpack.c.bf16 %v738_v61, %v734_v58 }
 0x14e   : > { %1083 = vmatprep.mubr.f32.mxu0 %v3105_v41 }
 0x14f   : > { %2215 = vmatpush1.bf16.msra.mxu0 %v2214_v11 }
 0x150   : > { %2217 = vmatprep.subr.bf16.mxu0 %v2216_v13 }
 0x1d4   : > { %v924_v24 = vpop.f32.mrb[0].mxu1 }
 0x1d5   : > { %v926_v41 = vpop.f32.mrb[1].mxu1  ;;  %v925_v32 = vadd.f32 %v924_v24, %v3280_v26  ;;  %v726_v24 = vld [vmem:[#allocation8 + $0x90] sm:$0xff] }
 0x1d6   : > { %v927_v38 = vadd.f32 %v926_v41, %v3284_v28  ;;  %v730_v41 = vld [vmem:[#allocation8 + $0xb0] sm:$0xff] }
 0x1d7   : > { %v2218_v50 = vpack.c.bf16 %v730_v41, %v726_v24 }
 0x1d8   : > { %v930_v30 = vpop.f32.mrb[2].mxu1 }
 0x1d9   : > { %v931_v34 = vadd.f32 %v930_v30, %v3280_v26  ;;  %v932_v36 = vpop.f32.mrb[3].mxu1  ;;  %2219 = vmatpush1.bf16.msra.mxu0 %v2218_v50  ;;  %v750_v50 = vld [vmem:[#allocation8 + $0x150] sm:$0xff] }
 0x1da   : > { %v933_v42 = vadd.f32 %v932_v36, %v3284_v28 }
 0x1db   : > { %v2274_v53 = vpack.c.bf16 %v931_v34, %v925_v32  ;;  %v735_v32 = vld [vmem:[#allocation8 + $0xd8] sm:$0xff] }
 0x1dc   : > { %v2272_v63 = vpack.c.bf16 %v933_v42, %v927_v38  ;;  %v936_v1 = vpop.f32.mrb[4].mxu1  ;;  %v739_v34 = vld [vmem:[#allocation8 + $0xf8] sm:$0xff] }
 0x1dd   : > { %v938_v9 = vpop.f32.mrb[5].mxu1  ;;  %v937_v36 = vadd.f32 %v936_v1, %v3280_v26  ;;  %v3297_v1 = vld [vmem:[%s3759_s3] sm:$0x3] }
 0x1de   : > { %2273 = vmatprep.subr.bf16.mxu1 %v2272_v63  ;;  %v939_v45 = vadd.f32 %v938_v9, %v3284_v28  ;;  %v742_v9 = vld [vmem:[#allocation8 + $0x110] sm:$0xff] }
 0x1df   : > { %2275 = vmatpush1.bf16.xpose.msra.mxu1 %v2274_v53  ;;  %v2220_v53 = vpack.c.bf16 %v739_v34, %v735_v32  ;;  %v751_v32 = vld [vmem:[#allocation8 + $0x158] sm:$0xff] }
 0x1e0   : > { %v942_v30 = vpop.f32.mrb[6].mxu1  ;;  %v755_v34 = vld [vmem:[#allocation8 + $0x178] sm:$0xff] }
 0x1e1   : > { %v943_v38 = vadd.f32 %v942_v30, %v3280_v26  ;;  %v944_v42 = vpop.f32.mrb[7].mxu1  ;;  %2221 = vmatprep.subr.bf16.mxu0 %v2220_v53  ;;  %v3303_v30 = vrot.slane %v3297_v1, %v3276_v22 }
 0x1e2   : > { %v945_v47 = vadd.f32 %v944_v42, %v3284_v28  ;;  %2223 = vmatpush1.bf16.msra.mxu0 %v2222_v6  ;;  %v2226_v42 = vpack.c.bf16 %v746_v10, %v742_v9  ;;  %v762_v10 = vld [vmem:[#allocation8 + $0x1b0] sm:$0xff] }
 0x1e3   : > { %v2278_v55 = vpack.c.bf16 %v943_v38, %v937_v36  ;;  %2225 = vmatprep.subr.bf16.mxu0 %v2224_v7  ;;  %v758_v7 = vld [vmem:[#allocation8 + $0x190] sm:$0xff] }
 0x1e4   : > { %v2276_v62 = vpack.c.bf16 %v945_v47, %v939_v45  ;;  %v948_v63 = vpop.f32.mrb[8].mxu1  ;;  %v3307_v47 = vpop.f32.mrb[0].mxu0 }
 0x1e5   : > { %v950_v5 = vpop.f32.mrb[9].mxu1  ;;  %v949_v13 = vadd.f32 %v948_v63, %v3280_v26  ;;  %v615_v61 = vpop.f32.mrb[1].mxu0  ;;  %v759_v63 = vld [vmem:[#allocation8 + $0x198] sm:$0xff] }
 0x1e6   : > { %2277 = vmatprep.subr.bf16.mxu1 %v2276_v62  ;;  %v951_v36 = vadd.f32 %v950_v5, %v3284_v28  ;;  %v2228_v62 = vpack.c.bf16 %v755_v34, %v751_v32  ;;  %2227 = vmatpush1.bf16.msra.mxu0 %v2226_v42  ;;  %v2232_v9 = vpack.c.bf16 %v763_v2, %v759_v63  ;;  %v771_v32 = vld [vmem:[#allocation8 + $0x1f8] sm:$0xff]  ;;  %v766_v63 = vld [vmem:[#allocation8 + $0x1d0] sm:$0xff] }
 0x1e7   : > { %2279 = vmatpush1.bf16.xpose.msra.mxu1 %v2278_v55  ;;  %v754_v55 = vld [vmem:[#allocation8 + $0x170] sm:$0xff] }
 0x1e8   : > { %v954_v11 = vpop.f32.mrb[10].mxu1  ;;  %v2230_v5 = vpack.c.bf16 %v754_v55, %v750_v50  ;;  %v3310_v6 = vpop.f32.mrb[2].mxu0  ;;  %2229 = vmatprep.subr.bf16.mxu0 %v2228_v62  ;;  %v2234_v50 = vpack.c.bf16 %v762_v10, %v758_v7  ;;  %v770_v62 = vld [vmem:[#allocation8 + $0x1f0] sm:$0xff] }
 0x1e9   : > { %v955_v24 = vadd.f32 %v954_v11, %v3280_v26  ;;  %v956_v41 = vpop.f32.mrb[11].mxu1  ;;  %v616_v11 = vadd.f32 %v615_v61, %v3303_v30  ;;  %v774_v10 = vld [vmem:[#allocation8 + $0x210] sm:$0xff] }
 0x1ea   : > { %v957_v38 = vadd.f32 %v956_v41, %v3284_v28  ;;  %v767_v41 = vld [vmem:[#allocation8 + $0x1d8] sm:$0xff]  ;;  %2231 = vmatpush1.bf16.msra.mxu0 %v2230_v5 }
 0x1eb   : > { %v2282_v45 = vpack.c.bf16 %v955_v24, %v949_v13  ;;  %1244 = vmatprep.mubr.f32.mxu1 %v616_v11  ;;  %v3312_v24 = vpop.f32.mrb[3].mxu0  ;;  %2233 = vmatprep.subr.bf16.mxu0 %v2232_v9  ;;  %v2236_v61 = vpack.c.bf16 %v771_v32, %v767_v41  ;;  %v778_v9 = vld [vmem:[#allocation8 + $0x230] sm:$0xff] }
 0x1ec   : > { %v2280_v53 = vpack.c.bf16 %v957_v38, %v951_v36  ;;  %v960_v58 = vpop.f32.mrb[12].mxu1 }
 0x1ed   : > { %v962_v3 = vpop.f32.mrb[13].mxu1  ;;  %v961_v34 = vadd.f32 %v960_v58, %v3280_v26  ;;  %v775_v58 = vld [vmem:[#allocation8 + $0x218] sm:$0xff] }
 0x1ee   : > { %2281 = vmatprep.subr.bf16.mxu1 %v2280_v53  ;;  %v963_v42 = vadd.f32 %v962_v3, %v3284_v28  ;;  %v3318_v53 = vpop.f32.mrb[4].mxu0  ;;  %2235 = vmatpush1.bf16.msra.mxu0 %v2234_v50  ;;  %v2238_v3 = vpack.c.bf16 %v770_v62, %v766_v63  ;;  %v2242_v63 = vpack.c.bf16 %v778_v9, %v774_v10 }
 0x1ef   : > { %2283 = vmatpush1.bf16.xpose.msra.mxu1 %v2282_v45  ;;  %v3320_v22 = vpop.f32.mrb[5].mxu0  ;;  %2237 = vmatprep.subr.bf16.mxu0 %v2236_v61 }
 0x1f0   : > { %v966_v13 = vpop.f32.mrb[14].mxu1  ;;  %v3322_v5 = vpop.f32.mrb[6].mxu0 }
 0x1f1   : > { %v967_v36 = vadd.f32 %v966_v13, %v3280_v26  ;;  %v968_v38 = vpop.f32.mrb[15].mxu1  ;;  %v779_v13 = vld [vmem:[#allocation8 + $0x238] sm:$0xff]  ;;  %v3324_v32 = vpop.f32.mrb[7].mxu0 }
 0x1f2   : > { %v969_v45 = vadd.f32 %v968_v38, %v3284_v28  ;;  %v2240_v7 = vpack.c.bf16 %v779_v13, %v775_v58  ;;  %2239 = vmatpush1.bf16.msra.mxu0 %v2238_v3  ;;  %v782_v58 = vld [vmem:[#allocation8 + $0x250] sm:$0xff] }
 0x1f3   : > { %v2286_v55 = vpack.c.bf16 %v967_v36, %v961_v34  ;;  %v783_v34 = vld [vmem:[#allocation8 + $0x258] sm:$0xff]  ;;  %v786_v13 = vld [vmem:[#allocation8 + $0x270] sm:$0xff] }
 0x1f4   : > { %v2284_v2 = vpack.c.bf16 %v969_v45, %v963_v42  ;;  %v972_v11 = vpop.f32.mrb[16].mxu1  ;;  %v787_v36 = vld [vmem:[#allocation8 + $0x278] sm:$0xff]  ;;  %v3330_v62 = vpop.f32.mrb[8].mxu0  ;;  %2241 = vmatprep.subr.bf16.mxu0 %v2240_v7 }
 0x1f5   : > { %v974_v20 = vpop.f32.mrb[17].mxu1  ;;  %v973_v38 = vadd.f32 %v972_v11, %v3280_v26  ;;  %v3332_v57 = vpop.f32.mrb[9].mxu0  ;;  %v791_v11 = vld [vmem:[#allocation8 + $0x298] sm:$0xff] }
 0x1f6   : > { %2285 = vmatprep.subr.bf16.mxu1 %v2284_v2  ;;  %v975_v50 = vadd.f32 %v974_v20, %v3284_v28  ;;  %v2244_v2 = vpack.c.bf16 %v787_v36, %v783_v34  ;;  %2243 = vmatpush1.bf16.msra.mxu0 %v2242_v63  ;;  %v2246_v20 = vpack.c.bf16 %v786_v13, %v782_v58 }
 0x1f7   : > { %2287 = vmatpush1.bf16.xpose.msra.mxu1 %v2286_v55 }
 0x1f8   : > { %v978_v41 = vpop.f32.mrb[18].mxu1  ;;  %v3334_v3 = vpop.f32.mrb[10].mxu0  ;;  %2245 = vmatprep.subr.bf16.mxu0 %v2244_v2 }
 0x1f9   : > { %v979_v42 = vadd.f32 %v978_v41, %v3280_v26  ;;  %v980_v45 = vpop.f32.mrb[19].mxu1  ;;  %v795_v41 = vld [vmem:[#allocation8 + $0x2b8] sm:$0xff]  ;;  %v645_v7 = vpop.f32.mrb[11].mxu0 }
 0x1fa   : > { %v981_v55 = vadd.f32 %v980_v45, %v3284_v28  ;;  %v2248_v10 = vpack.c.bf16 %v795_v41, %v791_v11  ;;  %2247 = vmatpush1.bf16.msra.mxu0 %v2246_v20 }
 0x1fb   : > { %v2290_v61 = vpack.c.bf16 %v979_v42, %v973_v38  ;;  %v3339_v42 = vadd.f32 %v645_v7, %v3303_v30 }
 0x1fc   : > { %v2288_v16 = vpack.c.bf16 %v981_v55, %v975_v50  ;;  %v984_v59 = vpop.f32.mrb[20].mxu1  ;;  %v3343_v55 = vpop.f32.mrb[12].mxu0  ;;  %2249 = vmatprep.subr.bf16.mxu0 %v2248_v10 }
 0x1fd   : > { %v986_v54 = vpop.f32.mrb[21].mxu1  ;;  %v985_v34 = vadd.f32 %v984_v59, %v3280_v26  ;;  %v651_v2 = vpop.f32.mrb[13].mxu0 }
 0x1fe   : > { %2289 = vmatprep.subr.bf16.mxu1 %v2288_v16  ;;  %v987_v45 = vadd.f32 %v986_v54, %v3284_v28  ;;  %v3346_v59 = vadd.f32 %v651_v2, %v3303_v30 }
 0x1ff   : > { %2291 = vmatpush1.bf16.xpose.msra.mxu1 %v2290_v61 }
 0x200   : > { %v990_v9 = vpop.f32.mrb[22].mxu1  ;;  %v3348_v13 = vpop.f32.mrb[14].mxu0 }
 0x201   : > { %v991_v36 = vadd.f32 %v990_v9, %v3280_v26  ;;  %v992_v38 = vpop.f32.mrb[23].mxu1  ;;  %v657_v54 = vpop.f32.mrb[15].mxu0 }
 0x202   : > { %v993_v16 = vadd.f32 %v992_v38, %v3284_v28  ;;  %v3353_v10 = vadd.f32 %v657_v54, %v3303_v30 }
 0x203   : > { %v2294_v50 = vpack.c.bf16 %v991_v36, %v985_v34 }
 0x204   : > { %v2292_v63 = vpack.c.bf16 %v993_v16, %v987_v45  ;;  %v996_v61 = vpop.f32.mrb[24].mxu1  ;;  %v3357_v38 = vpop.f32.mrb[16].mxu0 }
 0x205   : > { %v998_v58 = vpop.f32.mrb[25].mxu1  ;;  %v997_v41 = vadd.f32 %v996_v61, %v3280_v26 }
 0x206   : > { %2293 = vmatprep.subr.bf16.mxu1 %v2292_v63  ;;  %v999_v7 = vadd.f32 %v998_v58, %v3284_v28 }
 0x207   : > { %2295 = vmatpush1.bf16.xpose.msra.mxu1 %v2294_v50  ;;  %v663_v50 = vpop.f32.mrb[17].mxu0 }
 0x208   : > { %v1002_v11 = vpop.f32.mrb[26].mxu1  ;;  %v664_v2 = vadd.f32 %v663_v50, %v3303_v30  ;;  %v3360_v61 = vpop.f32.mrb[18].mxu0 }
 0x209   : > { %v1003_v20 = vadd.f32 %v1002_v11, %v3280_v26  ;;  %v1004_v9 = vpop.f32.mrb[27].mxu1  ;;  %v669_v54 = vpop.f32.mrb[19].mxu0 }
 0x20a   : > { %v1005_v34 = vadd.f32 %v1004_v9, %v3284_v28 }
 0x20b   : > { %v2298_v36 = vpack.c.bf16 %v1003_v20, %v997_v41  ;;  %v670_v41 = vadd.f32 %v669_v54, %v3303_v30 }
 0x20c   : > { %v2296_v45 = vpack.c.bf16 %v1005_v34, %v999_v7  ;;  %v1008_v16 = vpop.f32.mrb[28].mxu1  ;;  %v673_v49 = vpop.f32.mrb[20].mxu0 }
 0x20d   : > { %v1010_v63 = vpop.f32.mrb[29].mxu1  ;;  %v1009_v51 = vadd.f32 %v1008_v16, %v3280_v26  ;;  %v3370_v16 = vrot.slane %v3297_v1, %v3268_v18 }
 0x20e   : > { %2297 = vmatprep.subr.bf16.mxu1 %v2296_v45  ;;  %v1011_v20 = vadd.f32 %v1010_v63, %v3284_v28  ;;  %v675_v45 = vpop.f32.mrb[21].mxu0  ;;  %v622_v63 = vadd.f32 %v3312_v24, %v3303_v30 }
 0x20f   : > { %2299 = vmatpush1.bf16.xpose.msra.mxu1 %v2298_v36  ;;  %v676_v36 = vadd.f32 %v675_v45, %v3303_v30 }
 0x210   : > { %v1014_v11 = vpop.f32.mrb[30].mxu1  ;;  %v679_v46 = vpop.f32.mrb[22].mxu0 }
 0x211   : > { %v1015_v58 = vadd.f32 %v1014_v11, %v3280_v26  ;;  %v1016_v9 = vpop.f32.mrb[31].mxu1  ;;  %v681_v26 = vpop.f32.mrb[23].mxu0 }
 0x212   : > { %v1017_v7 = vadd.f32 %v1016_v9, %v3284_v28  ;;  %v682_v11 = vadd.f32 %v681_v26, %v3303_v30  ;;  %v628_v9 = vadd.f32 %v3320_v22, %v3303_v30  ;;  %v640_v22 = vadd.f32 %v3332_v57, %v3303_v30 }
 0x213   : > { %v2302_v34 = vpack.c.bf16 %v1015_v58, %v1009_v51  ;;  %v614_v51 = vadd.f32 %v3307_v47, %v3370_v16  ;;  %v634_v47 = vadd.f32 %v3324_v32, %v3303_v30  ;;  %v644_v32 = vadd.f32 %v3334_v3, %v3370_v16 }
 0x214   : > { %v2300_v50 = vpack.c.bf16 %v1017_v7, %v1011_v20  ;;  %v685_v28 = vpop.f32.mrb[24].mxu0  ;;  %v620_v20 = vadd.f32 %v3310_v6, %v3370_v16  ;;  %v650_v57 = vadd.f32 %v3343_v55, %v3370_v16  ;;  %v674_v3 = vadd.f32 %v673_v49, %v3370_v16 }
 0x215   : > { %v687_v54 = vpop.f32.mrb[25].mxu0  ;;  %v686_v55 = vadd.f32 %v685_v28, %v3370_v16 }
 0x216   : > { %2301 = vmatprep.subr.bf16.mxu1 %v2300_v50  ;;  %v688_v58 = vadd.f32 %v687_v54, %v3303_v30  ;;  %v626_v50 = vadd.f32 %v3318_v53, %v3370_v16  ;;  %v638_v53 = vadd.f32 %v3330_v62, %v3370_v16  ;;  %v668_v62 = vadd.f32 %v3360_v61, %v3370_v16  ;;  %v803_v61 = vld [vmem:[#allocation8 + $0x2f8] sm:$0xff] }
 0x217   : > { %2303 = vmatpush1.bf16.xpose.msra.mxu1 %v2302_v34 }
 0x218   : > { %v691_v1 = vpop.f32.mrb[26].mxu0 }
 0x219   : > { %v693_v7 = vpop.f32.mrb[27].mxu0 }
 0x21a   : > { %v694_v34 = vadd.f32 %v693_v7, %v3303_v30  ;;  %v810_v7 = vld [vmem:[#allocation8 + $0x330] sm:$0xff] }
 0x21c   : > { %v697_v24 = vpop.f32.mrb[28].mxu0 }
 0x21d   : > { %v699_v45 = vpop.f32.mrb[29].mxu0 }
 0x21e   : > { %1245 = vmatmul.mubr.f32.vlgmr.msra.gmra.mrb[32].mxu1 %v614_v51  ;;  %v700_v26 = vadd.f32 %v699_v45, %v3303_v30  ;;  %v818_v45 = vld [vmem:[#allocation8 + $0x370] sm:$0xff] }
 0x21f   : > { %1249 = vmatprep.mubr.f32.mxu1 %v622_v63  ;;  %v632_v63 = vadd.f32 %v3322_v5, %v3370_v16  ;;  %v662_v5 = vadd.f32 %v3357_v38, %v3370_v16  ;;  %v794_v38 = vld [vmem:[#allocation8 + $0x2b0] sm:$0xff] }
 0x220   : > { %v703_v6 = vpop.f32.mrb[30].mxu0 }
 0x221   : > { %v705_v51 = vpop.f32.mrb[31].mxu0  ;;  %v704_v49 = vadd.f32 %v703_v6, %v3370_v16  ;;  %v827_v6 = vld [vmem:[#allocation8 + $0x3b8] sm:$0xff] }
 0x222   : > { %1250 = vmatmul.mubr.f32.gmra.mrb[34].mxu1 %v620_v20  ;;  %v706_v54 = vadd.f32 %v705_v51, %v3303_v30  ;;  %v656_v30 = vadd.f32 %v3348_v13, %v3370_v16  ;;  %v698_v13 = vadd.f32 %v697_v24, %v3370_v16  ;;  %v806_v20 = vld [vmem:[#allocation8 + $0x310] sm:$0xff] }
 0x223   : > { %1254 = vmatprep.mubr.f32.mxu1 %v628_v9  ;;  %v811_v9 = vld [vmem:[#allocation8 + $0x338] sm:$0xff]  ;;  %v822_v51 = vld [vmem:[#allocation8 + $0x390] sm:$0xff] }
 0x226   : > { %1255 = vmatmul.mubr.f32.gmra.mrb[36].mxu1 %v626_v50  ;;  %v814_v50 = vld [vmem:[#allocation8 + $0x350] sm:$0xff] }
 0x227   : > { %1259 = vmatprep.mubr.f32.mxu1 %v634_v47  ;;  %v819_v47 = vld [vmem:[#allocation8 + $0x378] sm:$0xff] }
 0x22a   : > { %1260 = vmatmul.mubr.f32.gmra.mrb[38].mxu1 %v632_v63 }
 0x22b   : > { %1264 = vmatprep.mubr.f32.mxu1 %v640_v22  ;;  %v823_v22 = vld [vmem:[#allocation8 + $0x398] sm:$0xff] }
 0x22c   : > { %v2264_v63 = vpack.c.bf16 %v827_v6, %v823_v22 }
 0x22e   : > { %1265 = vmatmul.mubr.f32.gmra.mrb[40].mxu1 %v638_v53 }
 0x22f   : > { %1269 = vmatprep.mubr.f32.mxu1 %v3339_v42  ;;  %v680_v42 = vadd.f32 %v679_v46, %v3370_v16 }
 0x232   : > { %1270 = vmatmul.mubr.f32.gmra.mrb[42].mxu1 %v644_v32  ;;  %v831_v32 = vld [vmem:[#allocation8 + $0x3d8] sm:$0xff] }
 0x233   : > { %1274 = vmatprep.mubr.f32.mxu1 %v3346_v59  ;;  %v692_v59 = vadd.f32 %v691_v1, %v3370_v16  ;;  %v2258_v16 = vpack.c.bf16 %v810_v7, %v806_v20 }
 0x236   : > { %1275 = vmatmul.mubr.f32.gmra.mrb[44].mxu1 %v650_v57  ;;  %v835_v57 = vld [vmem:[#allocation8 + $0x3f8] sm:$0xff] }
 0x237   : > { %1279 = vmatprep.mubr.f32.mxu1 %v3353_v10  ;;  %v790_v10 = vld [vmem:[#allocation8 + $0x290] sm:$0xff] }
 0x238   : > { %v2250_v46 = vpack.c.bf16 %v794_v38, %v790_v10 }
 0x23a   : > { %1280 = vmatmul.mubr.f32.gmra.mrb[46].mxu1 %v656_v30  ;;  %2251 = vmatpush1.bf16.msra.mxu0 %v2250_v46  ;;  %v2268_v30 = vpack.c.bf16 %v835_v57, %v831_v32  ;;  %v3828_v32 = vld [vmem:[#allocation28_spill] sm:$0xff] }
 0x23b   : > { %1284 = vmatprep.mubr.f32.mxu1 %v664_v2  ;;  %v799_v2 = vld [vmem:[#allocation8 + $0x2d8] sm:$0xff] }
 0x23e   : > { %1285 = vmatmul.mubr.f32.gmra.mrb[48].mxu1 %v662_v5  ;;  %v830_v5 = vld [vmem:[#allocation8 + $0x3d0] sm:$0xff] }
 0x23f   : > { %1289 = vmatprep.mubr.f32.mxu1 %v670_v41  ;;  %v2252_v41 = vpack.c.bf16 %v803_v61, %v799_v2 }
 0x241   : > { %2253 = vmatprep.subr.bf16.mxu0 %v2252_v41 }
 0x242   : > { %1290 = vmatmul.mubr.f32.gmra.mrb[50].mxu1 %v668_v62  ;;  %v834_v62 = vld [vmem:[#allocation8 + $0x3f0] sm:$0xff] }
 0x243   : > { %1294 = vmatprep.mubr.f32.mxu1 %v676_v36  ;;  %v798_v36 = vld [vmem:[#allocation8 + $0x2d0] sm:$0xff] }
 0x246   : > { %1295 = vmatmul.mubr.f32.gmra.mrb[52].mxu1 %v674_v3  ;;  %v2270_v3 = vpack.c.bf16 %v834_v62, %v830_v5 }
 0x247   : > { %1299 = vmatprep.mubr.f32.mxu1 %v682_v11  ;;  %v802_v11 = vld [vmem:[#allocation8 + $0x2f0] sm:$0xff] }
 0x248   : > { %v2254_v28 = vpack.c.bf16 %v802_v11, %v798_v36 }
 0x24a   : > { %1300 = vmatmul.mubr.f32.gmra.mrb[54].mxu1 %v680_v42  ;;  %2255 = vmatpush1.bf16.msra.mxu0 %v2254_v28 }
 0x24b   : > { %1304 = vmatprep.mubr.f32.mxu1 %v688_v58  ;;  %v807_v58 = vld [vmem:[#allocation8 + $0x318] sm:$0xff] }
 0x24c   : > { %v2256_v1 = vpack.c.bf16 %v811_v9, %v807_v58 }
 0x24e   : > { %1305 = vmatmul.mubr.f32.gmra.mrb[56].mxu1 %v686_v55  ;;  %2257 = vmatprep.subr.bf16.mxu0 %v2256_v1 }
 0x24f   : > { %1309 = vmatprep.mubr.f32.mxu1 %v694_v34  ;;  %v815_v34 = vld [vmem:[#allocation8 + $0x358] sm:$0xff]  ;;  %2259 = vmatpush1.bf16.msra.mxu0 %v2258_v16 }
 0x250   : > { %v2260_v24 = vpack.c.bf16 %v819_v47, %v815_v34 }
 0x252   : > { %1310 = vmatmul.mubr.f32.gmra.mrb[58].mxu1 %v692_v59  ;;  %2261 = vmatprep.subr.bf16.mxu0 %v2260_v24 }
 0x253   : > { %1314 = vmatprep.mubr.f32.mxu1 %v700_v26  ;;  %v2262_v26 = vpack.c.bf16 %v818_v45, %v814_v50 }
 0x255   : > { %2263 = vmatpush1.bf16.msra.mxu0 %v2262_v26 }
 0x256   : > { %1315 = vmatmul.mubr.f32.gmra.mrb[60].mxu1 %v698_v13  ;;  %2265 = vmatprep.subr.bf16.mxu0 %v2264_v63 }
 0x257   : > { %1319 = vmatprep.mubr.f32.mxu1 %v706_v54  ;;  %v826_v54 = vld [vmem:[#allocation8 + $0x3b0] sm:$0xff] }
 0x258   : > { %v2266_v53 = vpack.c.bf16 %v826_v54, %v822_v51  ;;  %v3827_v51 = vld [vmem:[#allocation27_spill] sm:$0xff] }
 0x259   : > { %v848_v54 = vsub.s32 2, %v3827_v51 }
 0x25a   : > { %1320 = vmatmul.mubr.f32.gmra.mrb[62].mxu1 %v704_v49  ;;  %2267 = vmatpush1.bf16.msra.mxu0 %v2266_v53  ;;  %v852_v53 = vsub.s32 3, %v3827_v51 }
 0x25b   : > { %2269 = vmatprep.subr.bf16.mxu0 %v2268_v30  ;;  %v3496_v57 = vrot.slane %v3828_v32, %v848_v54 }
 0x25c   : > { %v3499_v5 = vrot.slane %v3828_v32, %v852_v53 }
 0x25e   : > { %2271 = vmatpush1.bf16.msra.mxu0 %v2270_v3 }
 0x261   : > { %1084 = vmatmul.mubr.f32.vlgmr.msra.gmra.mrb[32].mxu0 %v3110_v39  ;;  %v3821_v39 = vld [vmem:[#allocation21_spill] sm:$0xff] }
 0x262   : > { %1089 = vmatprep.mubr.f32.mxu0 %v3113_v44  ;;  %v3822_v44 = vld [vmem:[#allocation22_spill] sm:$0xff] }
 0x265   : > { %1090 = vmatmul.mubr.f32.gmra.mrb[34].mxu0 %v3118_v48  ;;  %v3823_v48 = vld [vmem:[#allocation23_spill] sm:$0xff] }
 0x266   : > { %1095 = vmatprep.mubr.f32.mxu0 %v3121_v52  ;;  %v3824_v52 = vld [vmem:[#allocation24_spill] sm:$0xff] }
 0x269   : > { %1096 = vmatmul.mubr.f32.gmra.mrb[36].mxu0 %v3126_v56  ;;  %v3825_v56 = vld [vmem:[#allocation25_spill] sm:$0xff] }
 0x26a   : > { %1101 = vmatprep.mubr.f32.mxu0 %v3129_v60  ;;  %v3826_v60 = vld [vmem:[#allocation26_spill] sm:$0xff] }
 0x26d   : > { %1102 = vmatmul.mubr.f32.gmra.mrb[38].mxu0 %v3134_v0 }
 0x26e   : > { %1107 = vmatprep.mubr.f32.mxu0 %v3137_v4 }
 0x271   : > { %1108 = vmatmul.mubr.f32.gmra.mrb[40].mxu0 %v3142_v8 }
 0x272   : > { %1113 = vmatprep.mubr.f32.mxu0 %v3145_v12 }
 0x275   : > { %1114 = vmatmul.mubr.f32.gmra.mrb[42].mxu0 %v3150_v14 }
 0x276   : > { %1119 = vmatprep.mubr.f32.mxu0 %v3153_v15 }
 0x279   : > { %1120 = vmatmul.mubr.f32.gmra.mrb[44].mxu0 %v3159_v17 }
 0x27a   : > { %1125 = vmatprep.mubr.f32.mxu0 %v3163_v19 }
 0x27d   : > { %1126 = vmatmul.mubr.f32.gmra.mrb[46].mxu0 %v3169_v21 }
 0x27e   : > { %1131 = vmatprep.mubr.f32.mxu0 %v3173_v23 }
 0x281   : > { %1132 = vmatmul.mubr.f32.gmra.mrb[48].mxu0 %v3179_v25 }
 0x282   : > { %1137 = vmatprep.mubr.f32.mxu0 %v3183_v27 }
 0x285   : > { %1138 = vmatmul.mubr.f32.gmra.mrb[50].mxu0 %v3189_v29 }
 0x286   : > { %1143 = vmatprep.mubr.f32.mxu0 %v3193_v31 }
 0x289   : > { %1144 = vmatmul.mubr.f32.gmra.mrb[52].mxu0 %v3199_v33 }
 0x28a   : > { %1149 = vmatprep.mubr.f32.mxu0 %v3203_v35 }
 0x28d   : > { %1150 = vmatmul.mubr.f32.gmra.mrb[54].mxu0 %v3209_v37 }
 0x28e   : > { %1155 = vmatprep.mubr.f32.mxu0 %v3213_v40 }
 0x291   : > { %1156 = vmatmul.mubr.f32.gmra.mrb[56].mxu0 %v3219_v43 }
 0x292   : > { %1161 = vmatprep.mubr.f32.mxu0 %v3821_v39 }
 0x295   : > { %1162 = vmatmul.mubr.f32.gmra.mrb[58].mxu0 %v3822_v44 }
 0x296   : > { %1167 = vmatprep.mubr.f32.mxu0 %v3823_v48 }
 0x299   : > { %1168 = vmatmul.mubr.f32.gmra.mrb[60].mxu0 %v3824_v52 }
 0x29a   : > { %1173 = vmatprep.mubr.f32.mxu0 %v3825_v56 }
 0x29d   : > { %1174 = vmatmul.mubr.f32.gmra.mrb[62].mxu0 %v3826_v60 }
 0x2f1   : > { %v1246_v0 = vpop.f32.mrb[32].mxu1 }
 0x2f2   : > { %v3445_v4 = vmul.f32 0.0625, %v1246_v0  ;;  %v1248_v8 = vpop.f32.mrb[33].mxu1 }
 0x2f4   : > { %1341 = vmax.xlane.f32.xlu0 %v3445_v4 }
 0x2f5   : > { %v1251_v12 = vpop.f32.mrb[34].mxu1 }
 0x2f6   : > { %v3448_v14 = vmul.f32 0.0625, %v1251_v12  ;;  %v1253_v15 = vpop.f32.mrb[35].mxu1 }
 0x2f8   : > { %1343 = vmax.xlane.f32.xlu0 %v3448_v14 }
 0x2f9   : > { %v1256_v17 = vpop.f32.mrb[36].mxu1 }
 0x2fa   : > { %v3451_v19 = vmul.f32 0.0625, %v1256_v17  ;;  %v1258_v21 = vpop.f32.mrb[37].mxu1 }
 0x2fc   : > { %1345 = vmax.xlane.f32.xlu1 %v3451_v19 }
 0x2fd   : > { %v1261_v23 = vpop.f32.mrb[38].mxu1 }
 0x2fe   : > { %v3454_v25 = vmul.f32 0.0625, %v1261_v23  ;;  %v1263_v27 = vpop.f32.mrb[39].mxu1 }
 0x300   : > { %1347 = vmax.xlane.f32.xlu1 %v3454_v25 }
 0x301   : > { %v1266_v29 = vpop.f32.mrb[40].mxu1 }
 0x302   : > { %v3457_v31 = vmul.f32 0.0625, %v1266_v29  ;;  %v1268_v33 = vpop.f32.mrb[41].mxu1 }
 0x304   : > { %1349 = vmax.xlane.f32.xlu0 %v3457_v31 }
 0x305   : > { %v1271_v35 = vpop.f32.mrb[42].mxu1 }
 0x306   : > { %v3460_v37 = vmul.f32 0.0625, %v1271_v35  ;;  %v1273_v40 = vpop.f32.mrb[43].mxu1 }
 0x308   : > { %1351 = vmax.xlane.f32.xlu1 %v3460_v37 }
 0x309   : > { %v1276_v43 = vpop.f32.mrb[44].mxu1 }
 0x30a   : > { %v3463_v42 = vmul.f32 0.0625, %v1276_v43  ;;  %v1278_v55 = vpop.f32.mrb[45].mxu1 }
 0x30c   : > { %1353 = vmax.xlane.f32.xlu0 %v3463_v42 }
 0x30d   : > { %v1281_v59 = vpop.f32.mrb[46].mxu1 }
 0x30e   : > { %v3466_v13 = vmul.f32 0.0625, %v1281_v59  ;;  %v1283_v49 = vpop.f32.mrb[47].mxu1 }
 0x310   : > { %1355 = vmax.xlane.f32.xlu1 %v3466_v13 }
 0x311   : > { %v1286_v10 = vpop.f32.mrb[48].mxu1 }
 0x312   : > { %v3469_v38 = vmul.f32 0.0625, %v1286_v10  ;;  %v1288_v46 = vpop.f32.mrb[49].mxu1 }
 0x314   : > { %1357 = vmax.xlane.f32.xlu0 %v3469_v38 }
 0x315   : > { %v1291_v2 = vpop.f32.mrb[50].mxu1 }
 0x316   : > { %v3472_v61 = vmul.f32 0.0625, %v1291_v2  ;;  %v1293_v41 = vpop.f32.mrb[51].mxu1 }
 0x318   : > { %1359 = vmax.xlane.f32.xlu1 %v3472_v61 }
 0x319   : > { %v1296_v36 = vpop.f32.mrb[52].mxu1 }
 0x31a   : > { %v3475_v11 = vmul.f32 0.0625, %v1296_v36  ;;  %v1298_v28 = vpop.f32.mrb[53].mxu1 }
 0x31c   : > { %1361 = vmax.xlane.f32.xlu0 %v3475_v11 }
 0x31d   : > { %v1301_v58 = vpop.f32.mrb[54].mxu1 }
 0x31e   : > { %v3478_v9 = vmul.f32 0.0625, %v1301_v58  ;;  %v1303_v1 = vpop.f32.mrb[55].mxu1 }
 0x320   : > { %1363 = vmax.xlane.f32.xlu1 %v3478_v9 }
 0x321   : > { %v1306_v20 = vpop.f32.mrb[56].mxu1 }
 0x322   : > { %v3481_v7 = vmul.f32 0.0625, %v1306_v20  ;;  %v1308_v16 = vpop.f32.mrb[57].mxu1 }
 0x324   : > { %1365 = vmax.xlane.f32.xlu0 %v3481_v7 }
 0x325   : > { %v1311_v34 = vpop.f32.mrb[58].mxu1 }
 0x326   : > { %v3484_v47 = vmul.f32 0.0625, %v1311_v34  ;;  %v1313_v24 = vpop.f32.mrb[59].mxu1 }
 0x328   : > { %1367 = vmax.xlane.f32.xlu1 %v3484_v47 }
 0x329   : > { %v1316_v50 = vpop.f32.mrb[60].mxu1 }
 0x32a   : > { %v3487_v45 = vmul.f32 0.0625, %v1316_v50  ;;  %v1318_v26 = vpop.f32.mrb[61].mxu1 }
 0x32c   : > { %1369 = vmax.xlane.f32.xlu0 %v3487_v45 }
 0x32d   : > { %v1321_v22 = vpop.f32.mrb[62].mxu1 }
 0x32e   : > { %v3490_v6 = vmul.f32 0.0625, %v1321_v22  ;;  %v1323_v63 = vpop.f32.mrb[63].mxu1 }
 0x330   : > { %1371 = vmax.xlane.f32.xlu1 %v3490_v6 }
 0x334   : > { %v1085_v30 = vpop.f32.mrb[32].mxu0 }
 0x335   : > { %v1087_v62 = vpop.f32.mrb[33].mxu0  ;;  %v1086_v3 = vadd.f32 %v1085_v30, %v3496_v57 }
 0x336   : > { %v1088_v39 = vadd.f32 %v1087_v62, %v3499_v5 }
 0x338   : > { %v1091_v44 = vpop.f32.mrb[34].mxu0 }
 0x339   : > { %v1092_v48 = vadd.f32 %v1091_v44, %v3496_v57  ;;  %v1093_v52 = vpop.f32.mrb[35].mxu0 }
 0x33a   : > { %v1094_v56 = vadd.f32 %v1093_v52, %v3499_v5 }
 0x33b   : > { %v2306_v60 = vpack.c.bf16 %v1092_v48, %v1086_v3 }
 0x33c   : > { %v2304_v0 = vpack.c.bf16 %v1094_v56, %v1088_v39  ;;  %v1097_v8 = vpop.f32.mrb[36].mxu0 }
 0x33d   : > { %v1099_v12 = vpop.f32.mrb[37].mxu0  ;;  %v1098_v15 = vadd.f32 %v1097_v8, %v3496_v57 }
 0x33e   : > { %2305 = vmatprep.subr.bf16.mxu0 %v2304_v0  ;;  %v1100_v17 = vadd.f32 %v1099_v12, %v3499_v5 }
 0x33f   : > { %2307 = vmatpush1.bf16.msra.mxu0 %v2306_v60 }
 0x340   : > { %v1103_v21 = vpop.f32.mrb[38].mxu0 }
 0x341   : > { %v1104_v23 = vadd.f32 %v1103_v21, %v3496_v57  ;;  %v1105_v27 = vpop.f32.mrb[39].mxu0 }
 0x342   : > { %v1106_v29 = vadd.f32 %v1105_v27, %v3499_v5 }
 0x343   : > { %v2310_v33 = vpack.c.bf16 %v1104_v23, %v1098_v15 }
 0x344   : > { %v2308_v35 = vpack.c.bf16 %v1106_v29, %v1100_v17  ;;  %v1109_v40 = vpop.f32.mrb[40].mxu0 }
 0x345   : > { %v1111_v43 = vpop.f32.mrb[41].mxu0  ;;  %v1110_v55 = vadd.f32 %v1109_v40, %v3496_v57 }
 0x346   : > { %2309 = vmatprep.subr.bf16.mxu0 %v2308_v35  ;;  %v1112_v59 = vadd.f32 %v1111_v43, %v3499_v5 }
 0x347   : > { %2311 = vmatpush1.bf16.msra.mxu0 %v2310_v33 }
 0x348   : > { %v1115_v49 = vpop.f32.mrb[42].mxu0 }
 0x349   : > { %v1116_v10 = vadd.f32 %v1115_v49, %v3496_v57  ;;  %v1117_v46 = vpop.f32.mrb[43].mxu0 }
 0x34a   : > { %v1118_v2 = vadd.f32 %v1117_v46, %v3499_v5 }
 0x34b   : > { %v2314_v41 = vpack.c.bf16 %v1116_v10, %v1110_v55 }
 0x34c   : > { %v2312_v36 = vpack.c.bf16 %v1118_v2, %v1112_v59  ;;  %v1121_v28 = vpop.f32.mrb[44].mxu0 }
 0x34d   : > { %v1123_v58 = vpop.f32.mrb[45].mxu0  ;;  %v1122_v1 = vadd.f32 %v1121_v28, %v3496_v57 }
 0x34e   : > { %2313 = vmatprep.subr.bf16.mxu0 %v2312_v36  ;;  %v1124_v20 = vadd.f32 %v1123_v58, %v3499_v5 }
 0x34f   : > { %2315 = vmatpush1.bf16.msra.mxu0 %v2314_v41 }
 0x350   : > { %v1127_v16 = vpop.f32.mrb[46].mxu0 }
 0x351   : > { %v1128_v34 = vadd.f32 %v1127_v16, %v3496_v57  ;;  %v1129_v24 = vpop.f32.mrb[47].mxu0 }
 0x352   : > { %v1130_v50 = vadd.f32 %v1129_v24, %v3499_v5 }
 0x353   : > { %v2318_v26 = vpack.c.bf16 %v1128_v34, %v1122_v1 }
 0x354   : > { %v2316_v22 = vpack.c.bf16 %v1130_v50, %v1124_v20  ;;  %v1133_v63 = vpop.f32.mrb[48].mxu0 }
 0x355   : > { %v1135_v51 = vpop.f32.mrb[49].mxu0  ;;  %v1134_v32 = vadd.f32 %v1133_v63, %v3496_v57 }
 0x356   : > { %2317 = vmatprep.subr.bf16.mxu0 %v2316_v22  ;;  %v1136_v30 = vadd.f32 %v1135_v51, %v3499_v5 }
 0x357   : > { %2319 = vmatpush1.bf16.msra.mxu0 %v2318_v26 }
 0x358   : > { %v1139_v62 = vpop.f32.mrb[50].mxu0 }
 0x359   : > { %v1140_v39 = vadd.f32 %v1139_v62, %v3496_v57  ;;  %v1141_v44 = vpop.f32.mrb[51].mxu0 }
 0x35a   : > { %v1142_v52 = vadd.f32 %v1141_v44, %v3499_v5 }
 0x35b   : > { %v2322_v60 = vpack.c.bf16 %v1140_v39, %v1134_v32 }
 0x35c   : > { %v2320_v0 = vpack.c.bf16 %v1142_v52, %v1136_v30  ;;  %v1145_v8 = vpop.f32.mrb[52].mxu0 }
 0x35d   : > { %v1147_v12 = vpop.f32.mrb[53].mxu0  ;;  %v1146_v21 = vadd.f32 %v1145_v8, %v3496_v57 }
 0x35e   : > { %2321 = vmatprep.subr.bf16.mxu0 %v2320_v0  ;;  %v1148_v23 = vadd.f32 %v1147_v12, %v3499_v5 }
 0x35f   : > { %2323 = vmatpush1.bf16.msra.mxu0 %v2322_v60 }
 0x360   : > { %v1151_v27 = vpop.f32.mrb[54].mxu0 }
 0x361   : > { %v1152_v33 = vadd.f32 %v1151_v27, %v3496_v57 }
 0x363   : > { %v2326_v55 = vpack.c.bf16 %v1152_v33, %v1146_v21 }
 0x381   : > { %v1342_v54 = vpop.xlane.xlu0 %1341 }
 0x382   : > { %v1373_v53 = vsub.f32 %v3445_v4, %v1342_v54 }
 0x384   : > { %v1389_v3 = vmul.f32 1.442695, %v1373_v53 }
 0x385   : > { %v1344_v48 = vpop.xlane.xlu0 %1343 }
 0x386   : > { %2489 = vpow2.f32 %v1389_v3  ;;  %v1374_v56 = vsub.f32 %v3448_v14, %v1344_v48  ;;  %v1153_v14 = vpop.f32.mrb[55].mxu0 }
 0x387   : > { %v1154_v40 = vadd.f32 %v1153_v14, %v3499_v5  ;;  %v1157_v49 = vpop.f32.mrb[56].mxu0 }
 0x388   : > { %v1391_v4 = vmul.f32 1.442695, %v1374_v56  ;;  %v1159_v46 = vpop.f32.mrb[57].mxu0  ;;  %v1158_v36 = vadd.f32 %v1157_v49, %v3496_v57 }
 0x389   : > { %v1346_v15 = vpop.xlane.xlu1 %1345  ;;  %v2324_v59 = vpack.c.bf16 %v1154_v40, %v1148_v23  ;;  %v1160_v28 = vadd.f32 %v1159_v46, %v3499_v5 }
 0x38a   : > { %2491 = vpow2.f32 %v1391_v4  ;;  %v1375_v17 = vsub.f32 %v3451_v19, %v1346_v15 }
 0x38b   : > { %2325 = vmatprep.subr.bf16.mxu0 %v2324_v59 }
 0x38c   : > { %v1393_v29 = vmul.f32 1.442695, %v1375_v17  ;;  %2327 = vmatpush1.bf16.msra.mxu0 %v2326_v55 }
 0x38d   : > { %v1348_v35 = vpop.xlane.xlu1 %1347 }
 0x38e   : > { %2493 = vpow2.f32 %v1393_v29  ;;  %v1376_v43 = vsub.f32 %v3454_v25, %v1348_v35  ;;  %v1163_v25 = vpop.f32.mrb[58].mxu0 }
 0x38f   : > { %v1164_v20 = vadd.f32 %v1163_v25, %v3496_v57  ;;  %v1165_v16 = vpop.f32.mrb[59].mxu0 }
 0x390   : > { %v3529_v19 = vpop.eup %2489  ;;  %v1395_v10 = vmul.f32 1.442695, %v1376_v43  ;;  %v1166_v24 = vadd.f32 %v1165_v16, %v3499_v5  ;;  %v1169_v22 = vpop.f32.mrb[60].mxu0 }
 0x391   : > { %v1350_v2 = vpop.xlane.xlu0 %1349  ;;  %1421 = vadd.xlane.f32.xlu0 %v3529_v19  ;;  %v2330_v50 = vpack.c.bf16 %v1164_v20, %v1158_v36  ;;  %v1171_v54 = vpop.f32.mrb[61].mxu0  ;;  %v1170_v30 = vadd.f32 %v1169_v22, %v3496_v57  ;;  %v1651_v22 = vld [vmem:[#allocation10 + $0x28] sm:$0xff] }
 0x392   : > { %2495 = vpow2.f32 %v1395_v10  ;;  %v1377_v41 = vsub.f32 %v3457_v31, %v1350_v2  ;;  %v2328_v26 = vpack.c.bf16 %v1166_v24, %v1160_v28  ;;  %v1172_v62 = vadd.f32 %v1171_v54, %v3499_v5  ;;  %v1647_v24 = vld [vmem:[#allocation10 + $0x8] sm:$0xff] }
 0x394   : > { %v3535_v58 = vpop.eup %2491  ;;  %v1397_v1 = vmul.f32 1.442695, %v1377_v41  ;;  %2329 = vmatprep.subr.bf16.mxu0 %v2328_v26  ;;  %v1648_v26 = vld [vmem:[#allocation10 + $0x10] sm:$0xff] }
 0x395   : > { %v1352_v34 = vpop.xlane.xlu1 %1351  ;;  %1423 = vadd.xlane.f32.xlu1 %v3535_v58  ;;  %2331 = vmatpush1.bf16.msra.mxu0 %v2330_v50 }
 0x396   : > { %2497 = vpow2.f32 %v1397_v1  ;;  %v1378_v31 = vsub.f32 %v3460_v37, %v1352_v34  ;;  %v1175_v37 = vpop.f32.mrb[62].mxu0 }
 0x397   : > { %v1176_v44 = vadd.f32 %v1175_v37, %v3496_v57  ;;  %v1177_v48 = vpop.f32.mrb[63].mxu0  ;;  %v1657_v37 = vld [vmem:[#allocation10 + $0x58] sm:$0xff] }
 0x398   : > { %v3541_v63 = vpop.eup %2493  ;;  %v1399_v51 = vmul.f32 1.442695, %v1378_v31  ;;  %v1178_v56 = vadd.f32 %v1177_v48, %v3499_v5  ;;  %v1646_v31 = vld [vmem:[#allocation10] sm:$0xff] }
 0x399   : > { %v1354_v53 = vpop.xlane.xlu0 %1353  ;;  %1425 = vadd.xlane.f32.xlu0 %v3541_v63  ;;  %v2334_v60 = vpack.c.bf16 %v1176_v44, %v1170_v30  ;;  %v2338_v54 = vpack.c.bf16 %v1648_v26, %v1646_v31  ;;  %v1652_v30 = vld [vmem:[#allocation10 + $0x30] sm:$0xff]  ;;  %v1654_v48 = vld [vmem:[#allocation10 + $0x40] sm:$0xff]  ;;  %v1681_v31 = vld [vmem:[#allocation10 + $0x118] sm:$0xff] }
 0x39a   : > { %2499 = vpow2.f32 %v1399_v51  ;;  %v1379_v32 = vsub.f32 %v3463_v42, %v1354_v53  ;;  %v2332_v0 = vpack.c.bf16 %v1178_v56, %v1172_v62  ;;  %v1653_v51 = vld [vmem:[#allocation10 + $0x38] sm:$0xff]  ;;  %v1655_v62 = vld [vmem:[#allocation10 + $0x48] sm:$0xff] }
 0x39b   : > { %v2340_v53 = vpack.c.bf16 %v1653_v51, %v1651_v22  ;;  %v2344_v44 = vpack.c.bf16 %v1657_v37, %v1655_v62  ;;  %v1659_v56 = vld [vmem:[#allocation10 + $0x68] sm:$0xff]  ;;  %v1678_v22 = vld [vmem:[#allocation10 + $0x100] sm:$0xff]  ;;  %v1680_v51 = vld [vmem:[#allocation10 + $0x110] sm:$0xff] }
 0x39c   : > { %v3547_v3 = vpop.eup %2495  ;;  %v1401_v39 = vmul.f32 1.442695, %v1379_v32  ;;  %2333 = vmatprep.subr.bf16.mxu0 %v2332_v0  ;;  %v1650_v32 = vld [vmem:[#allocation10 + $0x20] sm:$0xff]  ;;  %v1684_v37 = vld [vmem:[#allocation10 + $0x130] sm:$0xff] }
 0x39d   : > { %v1356_v52 = vpop.xlane.xlu1 %1355  ;;  %1427 = vadd.xlane.f32.xlu1 %v3547_v3  ;;  %2335 = vmatpush1.bf16.msra.mxu0 %v2334_v60  ;;  %v1682_v62 = vld [vmem:[#allocation10 + $0x120] sm:$0xff] }
 0x39e   : > { %2501 = vpow2.f32 %v1401_v39  ;;  %v1380_v42 = vsub.f32 %v3466_v13, %v1356_v52  ;;  %v2342_v39 = vpack.c.bf16 %v1652_v30, %v1650_v32  ;;  %v1656_v52 = vld [vmem:[#allocation10 + $0x50] sm:$0xff]  ;;  %v2370_v32 = vpack.c.bf16 %v1680_v51, %v1678_v22 }
 0x39f   : > { %v2346_v60 = vpack.c.bf16 %v1656_v52, %v1654_v48  ;;  %v2374_v48 = vpack.c.bf16 %v1684_v37, %v1682_v62 }
 0x3a0   : > { %v3553_v8 = vpop.eup %2497  ;;  %v1403_v4 = vmul.f32 1.442695, %v1380_v42  ;;  %v1661_v42 = vld [vmem:[#allocation10 + $0x78] sm:$0xff] }
 0x3a1   : > { %v1358_v12 = vpop.xlane.xlu0 %1357  ;;  %1429 = vadd.xlane.f32.xlu0 %v3553_v8  ;;  %v2348_v0 = vpack.c.bf16 %v1661_v42, %v1659_v56  ;;  %v1686_v56 = vld [vmem:[#allocation10 + $0x140] sm:$0xff]  ;;  %v1688_v42 = vld [vmem:[#allocation10 + $0x150] sm:$0xff] }
 0x3a2   : > { %2503 = vpow2.f32 %v1403_v4  ;;  %v1381_v57 = vsub.f32 %v3469_v38, %v1358_v12  ;;  %v2786_v38 = vmov 0.0   ;;  %v1658_v4 = vld [vmem:[#allocation10 + $0x60] sm:$0xff]  ;;  %v1660_v12 = vld [vmem:[#allocation10 + $0x70] sm:$0xff] }
 0x3a3   : > { %1549 = vmatprep.mubr.f32.mxu0 %v2786_v38 }
 0x3a4   : > { %v3557_v15 = vpop.eup %2499  ;;  %v1405_v17 = vmul.f32 1.442695, %v1381_v57  ;;  %v1663_v57 = vld [vmem:[#allocation10 + $0x88] sm:$0xff] }
 0x3a5   : > { %v1360_v5 = vpop.xlane.xlu1 %1359  ;;  %1431 = vadd.xlane.f32.xlu1 %v3557_v15 }
 0x3a6   : > { %2505 = vpow2.f32 %v1405_v17  ;;  %v1382_v13 = vsub.f32 %v3472_v61, %v1360_v5  ;;  %v1665_v17 = vld [vmem:[#allocation10 + $0x98] sm:$0xff]  ;;  %v2350_v5 = vpack.c.bf16 %v1660_v12, %v1658_v4  ;;  %v2378_v4 = vpack.c.bf16 %v1688_v42, %v1686_v56 }
 0x3a8   : > { %v3561_v21 = vpop.eup %2501  ;;  %v1407_v23 = vmul.f32 1.442695, %v1382_v13  ;;  %v2352_v13 = vpack.c.bf16 %v1665_v17, %v1663_v57  ;;  %v1690_v57 = vld [vmem:[#allocation10 + $0x160] sm:$0xff]  ;;  %v1692_v17 = vld [vmem:[#allocation10 + $0x170] sm:$0xff] }
 0x3a9   : > { %v1362_v27 = vpop.xlane.xlu0 %1361  ;;  %1433 = vadd.xlane.f32.xlu0 %v3561_v21 }
 0x3aa   : > { %2507 = vpow2.f32 %v1407_v23  ;;  %v1383_v29 = vsub.f32 %v3475_v11, %v1362_v27  ;;  %v1662_v23 = vld [vmem:[#allocation10 + $0x80] sm:$0xff]  ;;  %v1664_v27 = vld [vmem:[#allocation10 + $0x90] sm:$0xff] }
 0x3ac   : > { %v3566_v33 = vpop.eup %2503  ;;  %v1409_v14 = vmul.f32 1.442695, %v1383_v29  ;;  %v1667_v29 = vld [vmem:[#allocation10 + $0xa8] sm:$0xff] }
 0x3ad   : > { %v1364_v35 = vpop.xlane.xlu1 %1363  ;;  %1435 = vadd.xlane.f32.xlu1 %v3566_v33 }
 0x3ae   : > { %2509 = vpow2.f32 %v1409_v14  ;;  %v1384_v61 = vsub.f32 %v3478_v9, %v1364_v35  ;;  %v1669_v14 = vld [vmem:[#allocation10 + $0xb8] sm:$0xff]  ;;  %v2354_v35 = vpack.c.bf16 %v1664_v27, %v1662_v23  ;;  %v2382_v23 = vpack.c.bf16 %v1692_v17, %v1690_v57 }
 0x3b0   : > { %v3570_v40 = vpop.eup %2505  ;;  %v1411_v43 = vmul.f32 1.442695, %v1384_v61  ;;  %v2356_v61 = vpack.c.bf16 %v1669_v14, %v1667_v29  ;;  %v1694_v29 = vld [vmem:[#allocation10 + $0x180] sm:$0xff]  ;;  %v1696_v14 = vld [vmem:[#allocation10 + $0x190] sm:$0xff] }
 0x3b1   : > { %v1366_v55 = vpop.xlane.xlu0 %1365  ;;  %1437 = vadd.xlane.f32.xlu0 %v3570_v40 }
 0x3b2   : > { %2511 = vpow2.f32 %v1411_v43  ;;  %v1385_v11 = vsub.f32 %v3481_v7, %v1366_v55  ;;  %v1666_v43 = vld [vmem:[#allocation10 + $0xa0] sm:$0xff]  ;;  %v1668_v55 = vld [vmem:[#allocation10 + $0xb0] sm:$0xff] }
 0x3b4   : > { %v3574_v59 = vpop.eup %2507  ;;  %v1413_v49 = vmul.f32 1.442695, %v1385_v11  ;;  %v1671_v11 = vld [vmem:[#allocation10 + $0xc8] sm:$0xff] }
 0x3b5   : > { %v1368_v10 = vpop.xlane.xlu1 %1367  ;;  %1439 = vadd.xlane.f32.xlu1 %v3574_v59 }
 0x3b6   : > { %2513 = vpow2.f32 %v1413_v49  ;;  %v1386_v46 = vsub.f32 %v3484_v47, %v1368_v10  ;;  %v1673_v49 = vld [vmem:[#allocation10 + $0xd8] sm:$0xff]  ;;  %v2358_v10 = vpack.c.bf16 %v1668_v55, %v1666_v43  ;;  %v2386_v43 = vpack.c.bf16 %v1696_v14, %v1694_v29 }
 0x3b8   : > { %v3578_v2 = vpop.eup %2509  ;;  %v1415_v9 = vmul.f32 1.442695, %v1386_v46  ;;  %v2360_v46 = vpack.c.bf16 %v1673_v49, %v1671_v11  ;;  %v1698_v11 = vld [vmem:[#allocation10 + $0x1a0] sm:$0xff]  ;;  %v1700_v49 = vld [vmem:[#allocation10 + $0x1b0] sm:$0xff] }
 0x3b9   : > { %1441 = vadd.xlane.f32.xlu0 %v3578_v2  ;;  %v1370_v41 = vpop.xlane.xlu0 %1369 }
 0x3ba   : > { %2515 = vpow2.f32 %v1415_v9  ;;  %v1387_v36 = vsub.f32 %v3487_v45, %v1370_v41  ;;  %v1670_v9 = vld [vmem:[#allocation10 + $0xc0] sm:$0xff]  ;;  %v1672_v41 = vld [vmem:[#allocation10 + $0xd0] sm:$0xff] }
 0x3bc   : > { %v3582_v28 = vpop.eup %2511  ;;  %v1417_v7 = vmul.f32 1.442695, %v1387_v36  ;;  %v1675_v36 = vld [vmem:[#allocation10 + $0xe8] sm:$0xff] }
 0x3bd   : > { %1443 = vadd.xlane.f32.xlu1 %v3582_v28  ;;  %v1372_v25 = vpop.xlane.xlu1 %1371 }
 0x3be   : > { %2517 = vpow2.f32 %v1417_v7  ;;  %v1388_v1 = vsub.f32 %v3490_v6, %v1372_v25  ;;  %v1649_v6 = vld [vmem:[#allocation10 + $0x18] sm:$0xff]  ;;  %v2362_v25 = vpack.c.bf16 %v1672_v41, %v1670_v9  ;;  %v2390_v9 = vpack.c.bf16 %v1700_v49, %v1698_v11 }
 0x3bf   : > { %v2336_v50 = vpack.c.bf16 %v1649_v6, %v1647_v24  ;;  %v1677_v7 = vld [vmem:[#allocation10 + $0xf8] sm:$0xff]  ;;  %v1676_v24 = vld [vmem:[#allocation10 + $0xf0] sm:$0xff]  ;;  %v1679_v6 = vld [vmem:[#allocation10 + $0x108] sm:$0xff] }
 0x3c0   : > { %v3586_v20 = vpop.eup %2513  ;;  %v1419_v47 = vmul.f32 1.442695, %v1388_v1  ;;  %v2364_v1 = vpack.c.bf16 %v1677_v7, %v1675_v36  ;;  %v2368_v26 = vpack.c.bf16 %v1681_v31, %v1679_v6  ;;  %v1702_v36 = vld [vmem:[#allocation10 + $0x1c0] sm:$0xff]  ;;  %v1704_v7 = vld [vmem:[#allocation10 + $0x1d0] sm:$0xff] }
 0x3c1   : > { %1445 = vadd.xlane.f32.xlu0 %v3586_v20  ;;  %2337 = vmatprep.subr.bf16.mxu1 %v2336_v50 }
 0x3c2   : > { %2519 = vpow2.f32 %v1419_v47  ;;  %2339 = vmatpush1.bf16.msra.mxu1 %v2338_v54  ;;  %v1674_v47 = vld [vmem:[#allocation10 + $0xe0] sm:$0xff]  ;;  %v1683_v54 = vld [vmem:[#allocation10 + $0x128] sm:$0xff] }
 0x3c3   : > { %2341 = vmatprep.subr.bf16.mxu1 %v2340_v53  ;;  %v2366_v50 = vpack.c.bf16 %v1676_v24, %v1674_v47  ;;  %v1685_v53 = vld [vmem:[#allocation10 + $0x138] sm:$0xff]  ;;  %v2394_v24 = vpack.c.bf16 %v1704_v7, %v1702_v36 }
 0x3c4   : > { %v3589_v16 = vpop.eup %2515  ;;  %v2372_v30 = vpack.c.bf16 %v1685_v53, %v1683_v54  ;;  %v1709_v47 = vld [vmem:[#allocation10 + $0x1f8] sm:$0xff] }
 0x3c5   : > { %1447 = vadd.xlane.f32.xlu1 %v3589_v16 }
 0x3c6   : > { %2343 = vmatpush1.bf16.msra.mxu1 %v2342_v39  ;;  %v1687_v39 = vld [vmem:[#allocation10 + $0x148] sm:$0xff] }
 0x3c7   : > { %2345 = vmatprep.subr.bf16.mxu1 %v2344_v44  ;;  %v1689_v44 = vld [vmem:[#allocation10 + $0x158] sm:$0xff] }
 0x3c8   : > { %v3592_v45 = vpop.eup %2517  ;;  %v2376_v52 = vpack.c.bf16 %v1689_v44, %v1687_v39 }
 0x3c9   : > { %1449 = vadd.xlane.f32.xlu0 %v3592_v45 }
 0x3ca   : > { %2347 = vmatpush1.bf16.msra.mxu1 %v2346_v60  ;;  %v1691_v60 = vld [vmem:[#allocation10 + $0x168] sm:$0xff] }
 0x3cb   : > { %2349 = vmatprep.subr.bf16.mxu1 %v2348_v0  ;;  %v1693_v0 = vld [vmem:[#allocation10 + $0x178] sm:$0xff] }
 0x3cc   : > { %v3595_v34 = vpop.eup %2519  ;;  %v2380_v12 = vpack.c.bf16 %v1693_v0, %v1691_v60 }
 0x3cd   : > { %1451 = vadd.xlane.f32.xlu1 %v3595_v34 }
 0x3ce   : > { %2351 = vmatpush1.bf16.msra.mxu1 %v2350_v5  ;;  %v1695_v5 = vld [vmem:[#allocation10 + $0x188] sm:$0xff] }
 0x3cf   : > { %2353 = vmatprep.subr.bf16.mxu1 %v2352_v13  ;;  %v1697_v13 = vld [vmem:[#allocation10 + $0x198] sm:$0xff] }
 0x3d0   : > { %v2384_v27 = vpack.c.bf16 %v1697_v13, %v1695_v5 }
 0x3d2   : > { %2355 = vmatpush1.bf16.msra.mxu1 %v2354_v35  ;;  %v1699_v35 = vld [vmem:[#allocation10 + $0x1a8] sm:$0xff] }
 0x3d3   : > { %2357 = vmatprep.subr.bf16.mxu1 %v2356_v61  ;;  %v1701_v61 = vld [vmem:[#allocation10 + $0x1b8] sm:$0xff] }
 0x3d4   : > { %v2388_v55 = vpack.c.bf16 %v1701_v61, %v1699_v35 }
 0x3d6   : > { %2359 = vmatpush1.bf16.msra.mxu1 %v2358_v10  ;;  %v1703_v10 = vld [vmem:[#allocation10 + $0x1c8] sm:$0xff] }
 0x3d7   : > { %2361 = vmatprep.subr.bf16.mxu1 %v2360_v46  ;;  %v1705_v46 = vld [vmem:[#allocation10 + $0x1d8] sm:$0xff] }
 0x3d8   : > { %v2392_v41 = vpack.c.bf16 %v1705_v46, %v1703_v10  ;;  %v1708_v10 = vld [vmem:[#allocation10 + $0x1f0] sm:$0xff] }
 0x3da   : > { %2363 = vmatpush1.bf16.msra.mxu1 %v2362_v25 }
 0x3db   : > { %2365 = vmatprep.subr.bf16.mxu1 %v2364_v1  ;;  %v1707_v1 = vld [vmem:[#allocation10 + $0x1e8] sm:$0xff] }
 0x3dc   : > { %v2396_v6 = vpack.c.bf16 %v1709_v47, %v1707_v1 }
 0x3de   : > { %2367 = vmatpush1.bf16.msra.mxu1 %v2366_v50 }
 0x3df   : > { %2369 = vmatprep.subr.bf16.mxu1 %v2368_v26 }
 0x3e2   : > { %2371 = vmatpush1.bf16.msra.mxu1 %v2370_v32 }
 0x3e3   : > { %2373 = vmatprep.subr.bf16.mxu1 %v2372_v30 }
 0x3e6   : > { %2375 = vmatpush1.bf16.msra.mxu1 %v2374_v48 }
 0x3e7   : > { %2377 = vmatprep.subr.bf16.mxu1 %v2376_v52 }
 0x3ea   : > { %2379 = vmatpush1.bf16.msra.mxu1 %v2378_v4 }
 0x3eb   : > { %2381 = vmatprep.subr.bf16.mxu1 %v2380_v12 }
 0x3ee   : > { %2383 = vmatpush1.bf16.msra.mxu1 %v2382_v23 }
 0x3ef   : > { %2385 = vmatprep.subr.bf16.mxu1 %v2384_v27 }
 0x3f2   : > { %2387 = vmatpush1.bf16.msra.mxu1 %v2386_v43 }
 0x3f3   : > { %2389 = vmatprep.subr.bf16.mxu1 %v2388_v55 }
 0x3f6   : > { %2391 = vmatpush1.bf16.msra.mxu1 %v2390_v9 }
 0x3f7   : > { %2393 = vmatprep.subr.bf16.mxu1 %v2392_v41 }
 0x3fa   : > { %2395 = vmatpush1.bf16.msra.mxu1 %v2394_v24 }
 0x3fb   : > { %2397 = vmatprep.subr.bf16.mxu1 %v2396_v6 }
 0x41e   : > { %v1422_v25 = vpop.xlane.xlu0 %1421 }
 0x41f   : > { %2521 = vrcp.f32 %v1422_v25 }
 0x422   : > { %v1424_v31 = vpop.xlane.xlu1 %1423 }
 0x423   : > { %2523 = vrcp.f32 %v1424_v31 }
 0x426   : > { %v1426_v50 = vpop.xlane.xlu0 %1425 }
 0x427   : > { %2525 = vrcp.f32 %v1426_v50 }
 0x429   : > { %v2522_v26 = vpop.eup %2521 }
 0x42a   : > { %v1469_v22 = vmul.f32 %v2522_v26, %v3529_v19  ;;  %v1428_v51 = vpop.xlane.xlu1 %1427 }
 0x42b   : > { %2527 = vrcp.f32 %v1428_v51 }
 0x42c   : > { %1550 = vmatmul.mubr.f32.vlgmr.msra.gmra.mrb[64].mxu0 %v1469_v22 }
 0x42d   : > { %v2524_v54 = vpop.eup %2523  ;;  %1555 = vmatprep.mubr.f32.mxu0 %v2786_v38 }
 0x42e   : > { %v1430_v53 = vpop.xlane.xlu0 %1429  ;;  %v1470_v32 = vmul.f32 %v2524_v54, %v3535_v58 }
 0x42f   : > { %2529 = vrcp.f32 %v1430_v53 }
 0x430   : > { %1556 = vmatmul.mubr.f32.gmra.mrb[66].mxu0 %v1470_v32 }
 0x431   : > { %v2526_v30 = vpop.eup %2525  ;;  %1561 = vmatprep.mubr.f32.mxu0 %v2786_v38 }
 0x432   : > { %v1432_v62 = vpop.xlane.xlu1 %1431  ;;  %v1471_v37 = vmul.f32 %v2526_v30, %v3541_v63 }
 0x433   : > { %2531 = vrcp.f32 %v1432_v62 }
 0x434   : > { %1562 = vmatmul.mubr.f32.gmra.mrb[68].mxu0 %v1471_v37 }
 0x435   : > { %v2528_v19 = vpop.eup %2527  ;;  %1567 = vmatprep.mubr.f32.mxu0 %v2786_v38 }
 0x436   : > { %v1434_v39 = vpop.xlane.xlu0 %1433  ;;  %v1472_v44 = vmul.f32 %v2528_v19, %v3547_v3 }
 0x437   : > { %2533 = vrcp.f32 %v1434_v39 }
 0x438   : > { %1568 = vmatmul.mubr.f32.gmra.mrb[70].mxu0 %v1472_v44 }
 0x439   : > { %v2530_v48 = vpop.eup %2529  ;;  %1573 = vmatprep.mubr.f32.mxu0 %v2786_v38 }
 0x43a   : > { %v1436_v58 = vpop.xlane.xlu1 %1435  ;;  %v1473_v52 = vmul.f32 %v2530_v48, %v3553_v8 }
 0x43b   : > { %2535 = vrcp.f32 %v1436_v58 }
 0x43c   : > { %1574 = vmatmul.mubr.f32.gmra.mrb[72].mxu0 %v1473_v52 }
 0x43d   : > { %v2532_v56 = vpop.eup %2531  ;;  %1579 = vmatprep.mubr.f32.mxu0 %v2786_v38 }
 0x43e   : > { %v1438_v63 = vpop.xlane.xlu0 %1437  ;;  %v1474_v42 = vmul.f32 %v2532_v56, %v3557_v15 }
 0x43f   : > { %2537 = vrcp.f32 %v1438_v63 }
 0x440   : > { %1580 = vmatmul.mubr.f32.gmra.mrb[74].mxu0 %v1474_v42  ;;  %v1710_v42 = vld [vmem:[%s3763_s7] sm:$0x3] }
 0x441   : > { %v2534_v60 = vpop.eup %2533  ;;  %1585 = vmatprep.mubr.f32.mxu0 %v2786_v38 }
 0x442   : > { %v1440_v3 = vpop.xlane.xlu1 %1439  ;;  %v1475_v0 = vmul.f32 %v2534_v60, %v3561_v21  ;;  %v3633_v60 = vrot.slane %v1710_v42, %v3268_v18 }
 0x443   : > { %2539 = vrcp.f32 %v1440_v3  ;;  %v3829_v3 = vld [vmem:[#allocation29_spill] sm:$0xff] }
 0x444   : > { %1586 = vmatmul.mubr.f32.gmra.mrb[76].mxu0 %v1475_v0  ;;  %v3636_v0 = vrot.slane %v1710_v42, %v3829_v3 }
 0x445   : > { %v2536_v4 = vpop.eup %2535  ;;  %1591 = vmatprep.mubr.f32.mxu0 %v2786_v38 }
 0x446   : > { %v1442_v8 = vpop.xlane.xlu0 %1441  ;;  %v1476_v12 = vmul.f32 %v2536_v4, %v3566_v33 }
 0x447   : > { %2541 = vrcp.f32 %v1442_v8 }
 0x448   : > { %1592 = vmatmul.mubr.f32.gmra.mrb[78].mxu0 %v1476_v12 }
 0x449   : > { %v2538_v57 = vpop.eup %2537  ;;  %1597 = vmatprep.mubr.f32.mxu0 %v2786_v38 }
 0x44a   : > { %v1444_v15 = vpop.xlane.xlu1 %1443  ;;  %v1477_v17 = vmul.f32 %v2538_v57, %v3570_v40 }
 0x44b   : > { %2543 = vrcp.f32 %v1444_v15 }
 0x44c   : > { %1598 = vmatmul.mubr.f32.gmra.mrb[80].mxu0 %v1477_v17 }
 0x44d   : > { %v2540_v5 = vpop.eup %2539  ;;  %1603 = vmatprep.mubr.f32.mxu0 %v2786_v38 }
 0x44e   : > { %v1446_v21 = vpop.xlane.xlu0 %1445  ;;  %v1478_v13 = vmul.f32 %v2540_v5, %v3574_v59 }
 0x44f   : > { %2545 = vrcp.f32 %v1446_v21 }
 0x450   : > { %1604 = vmatmul.mubr.f32.gmra.mrb[82].mxu0 %v1478_v13 }
 0x451   : > { %v2542_v23 = vpop.eup %2541  ;;  %1609 = vmatprep.mubr.f32.mxu0 %v2786_v38 }
 0x452   : > { %v1448_v33 = vpop.xlane.xlu1 %1447  ;;  %v1479_v27 = vmul.f32 %v2542_v23, %v3578_v2 }
 0x453   : > { %2547 = vrcp.f32 %v1448_v33 }
 0x454   : > { %1610 = vmatmul.mubr.f32.gmra.mrb[84].mxu0 %v1479_v27 }
 0x455   : > { %v2544_v29 = vpop.eup %2543  ;;  %1615 = vmatprep.mubr.f32.mxu0 %v2786_v38 }
 0x456   : > { %v1450_v40 = vpop.xlane.xlu0 %1449  ;;  %v1480_v14 = vmul.f32 %v2544_v29, %v3582_v28 }
 0x457   : > { %2549 = vrcp.f32 %v1450_v40 }
 0x458   : > { %1616 = vmatmul.mubr.f32.gmra.mrb[86].mxu0 %v1480_v14 }
 0x459   : > { %v2546_v35 = vpop.eup %2545  ;;  %1621 = vmatprep.mubr.f32.mxu0 %v2786_v38 }
 0x45a   : > { %v1452_v59 = vpop.xlane.xlu1 %1451  ;;  %v1481_v61 = vmul.f32 %v2546_v35, %v3586_v20  ;;  %v1706_v20 = vld [vmem:[#allocation10 + $0x1e0] sm:$0xff] }
 0x45b   : > { %2551 = vrcp.f32 %v1452_v59  ;;  %v2398_v46 = vpack.c.bf16 %v1708_v10, %v1706_v20 }
 0x45c   : > { %1622 = vmatmul.mubr.f32.gmra.mrb[88].mxu0 %v1481_v61 }
 0x45d   : > { %v2548_v43 = vpop.eup %2547  ;;  %1627 = vmatprep.mubr.f32.mxu0 %v2786_v38  ;;  %2399 = vmatpush1.bf16.msra.mxu1 %v2398_v46 }
 0x45e   : > { %v1482_v2 = vmul.f32 %v2548_v43, %v3589_v16 }
 0x460   : > { %1628 = vmatmul.mubr.f32.gmra.mrb[90].mxu0 %v1482_v2 }
 0x461   : > { %v2550_v55 = vpop.eup %2549  ;;  %1633 = vmatprep.mubr.f32.mxu0 %v2786_v38 }
 0x462   : > { %v1483_v28 = vmul.f32 %v2550_v55, %v3592_v45 }
 0x464   : > { %1634 = vmatmul.mubr.f32.gmra.mrb[92].mxu0 %v1483_v28 }
 0x465   : > { %v2552_v11 = vpop.eup %2551  ;;  %1639 = vmatprep.mubr.f32.mxu0 %v2786_v38 }
 0x466   : > { %v1484_v49 = vmul.f32 %v2552_v11, %v3595_v34 }
 0x468   : > { %1640 = vmatmul.mubr.f32.gmra.mrb[94].mxu0 %v1484_v49 }
 0x4ff   : > { %v1551_v9 = vpop.f32.mrb[64].mxu0 }
 0x500   : > { %v1553_v41 = vpop.f32.mrb[65].mxu0 }
 0x501   : > { %1786 = vmatprep.mubr.f32.mxu1 %v1553_v41 }
 0x502   : > { %1787 = vmatmul.mubr.f32.vlgmr.msra.gmra.mrb[64].mxu1 %v1551_v9 }
 0x503   : > { %v1557_v16 = vpop.f32.mrb[66].mxu0 }
 0x504   : > { %v1559_v36 = vpop.f32.mrb[67].mxu0 }
 0x505   : > { %1792 = vmatprep.mubr.f32.mxu1 %v1559_v36 }
 0x506   : > { %1793 = vmatmul.mubr.f32.gmra.mrb[66].mxu1 %v1557_v16 }
 0x507   : > { %v1563_v45 = vpop.f32.mrb[68].mxu0 }
 0x508   : > { %v1565_v7 = vpop.f32.mrb[69].mxu0 }
 0x509   : > { %1798 = vmatprep.mubr.f32.mxu1 %v1565_v7 }
 0x50a   : > { %1799 = vmatmul.mubr.f32.gmra.mrb[68].mxu1 %v1563_v45 }
 0x50b   : > { %v1569_v38 = vpop.f32.mrb[70].mxu0 }
 0x50c   : > { %v1571_v25 = vpop.f32.mrb[71].mxu0 }
 0x50d   : > { %1804 = vmatprep.mubr.f32.mxu1 %v1571_v25 }
 0x50e   : > { %1805 = vmatmul.mubr.f32.gmra.mrb[70].mxu1 %v1569_v38 }
 0x50f   : > { %v1575_v34 = vpop.f32.mrb[72].mxu0 }
 0x510   : > { %v1577_v1 = vpop.f32.mrb[73].mxu0 }
 0x511   : > { %1810 = vmatprep.mubr.f32.mxu1 %v1577_v1 }
 0x512   : > { %1811 = vmatmul.mubr.f32.gmra.mrb[72].mxu1 %v1575_v34 }
 0x513   : > { %v1581_v47 = vpop.f32.mrb[74].mxu0 }
 0x514   : > { %v1583_v24 = vpop.f32.mrb[75].mxu0 }
 0x515   : > { %1816 = vmatprep.mubr.f32.mxu1 %v1583_v24 }
 0x516   : > { %1817 = vmatmul.mubr.f32.gmra.mrb[74].mxu1 %v1581_v47 }
 0x517   : > { %v1587_v6 = vpop.f32.mrb[76].mxu0 }
 0x518   : > { %v1589_v31 = vpop.f32.mrb[77].mxu0 }
 0x519   : > { %1822 = vmatprep.mubr.f32.mxu1 %v1589_v31 }
 0x51a   : > { %1823 = vmatmul.mubr.f32.gmra.mrb[76].mxu1 %v1587_v6 }
 0x51b   : > { %v1593_v50 = vpop.f32.mrb[78].mxu0 }
 0x51c   : > { %v1595_v26 = vpop.f32.mrb[79].mxu0 }
 0x51d   : > { %1828 = vmatprep.mubr.f32.mxu1 %v1595_v26 }
 0x51e   : > { %1829 = vmatmul.mubr.f32.gmra.mrb[78].mxu1 %v1593_v50 }
 0x51f   : > { %v1599_v22 = vpop.f32.mrb[80].mxu0 }
 0x520   : > { %v1601_v51 = vpop.f32.mrb[81].mxu0 }
 0x521   : > { %1834 = vmatprep.mubr.f32.mxu1 %v1601_v51 }
 0x522   : > { %1835 = vmatmul.mubr.f32.gmra.mrb[80].mxu1 %v1599_v22 }
 0x523   : > { %v1605_v54 = vpop.f32.mrb[82].mxu0 }
 0x524   : > { %v1607_v53 = vpop.f32.mrb[83].mxu0 }
 0x525   : > { %1840 = vmatprep.mubr.f32.mxu1 %v1607_v53 }
 0x526   : > { %1841 = vmatmul.mubr.f32.gmra.mrb[82].mxu1 %v1605_v54 }
 0x527   : > { %v1611_v32 = vpop.f32.mrb[84].mxu0 }
 0x528   : > { %v1613_v30 = vpop.f32.mrb[85].mxu0 }
 0x529   : > { %1846 = vmatprep.mubr.f32.mxu1 %v1613_v30 }
 0x52a   : > { %1847 = vmatmul.mubr.f32.gmra.mrb[84].mxu1 %v1611_v32 }
 0x52b   : > { %v1617_v62 = vpop.f32.mrb[86].mxu0 }
 0x52c   : > { %v1619_v37 = vpop.f32.mrb[87].mxu0 }
 0x52d   : > { %1852 = vmatprep.mubr.f32.mxu1 %v1619_v37 }
 0x52e   : > { %1853 = vmatmul.mubr.f32.gmra.mrb[86].mxu1 %v1617_v62 }
 0x52f   : > { %v1623_v19 = vpop.f32.mrb[88].mxu0 }
 0x530   : > { %v1625_v39 = vpop.f32.mrb[89].mxu0 }
 0x531   : > { %1858 = vmatprep.mubr.f32.mxu1 %v1625_v39 }
 0x532   : > { %1859 = vmatmul.mubr.f32.gmra.mrb[88].mxu1 %v1623_v19 }
 0x533   : > { %v1629_v44 = vpop.f32.mrb[90].mxu0 }
 0x534   : > { %v1631_v48 = vpop.f32.mrb[91].mxu0 }
 0x535   : > { %1864 = vmatprep.mubr.f32.mxu1 %v1631_v48 }
 0x536   : > { %1865 = vmatmul.mubr.f32.gmra.mrb[90].mxu1 %v1629_v44 }
 0x537   : > { %v1635_v58 = vpop.f32.mrb[92].mxu0 }
 0x538   : > { %v1637_v52 = vpop.f32.mrb[93].mxu0 }
 0x539   : > { %1870 = vmatprep.mubr.f32.mxu1 %v1637_v52 }
 0x53a   : > { %1871 = vmatmul.mubr.f32.gmra.mrb[92].mxu1 %v1635_v58 }
 0x53b   : > { %v1641_v56 = vpop.f32.mrb[94].mxu0 }
 0x53c   : > { %v1643_v63 = vpop.f32.mrb[95].mxu0 }
 0x53d   : > { %1876 = vmatprep.mubr.f32.mxu1 %v1643_v63 }
 0x53e   : > { %1877 = vmatmul.mubr.f32.gmra.mrb[94].mxu1 %v1641_v56 }
 0x5d5   : > { %v1788_v4 = vpop.f32.mrb[64].mxu1 }
 0x5d6   : > { %v1789_v8 = vadd.f32 %v1788_v4, %v3633_v60  ;;  %v1790_v12 = vpop.f32.mrb[65].mxu1 }
 0x5d7   : > { %v1791_v57 = vadd.f32 %v1790_v12, %v3636_v0 }
 0x5d8   : > { %1883 = vst [vmem:[%s3641_s4] sm:$0xff] %v1789_v8 }
 0x5d9   : > { %1884 = vst [vmem:[%s3641_s4 + $0x8] sm:$0xff] %v1791_v57  ;;  %v1794_v18 = vpop.f32.mrb[66].mxu1 }
 0x5da   : > { %v1795_v15 = vadd.f32 %v1794_v18, %v3633_v60  ;;  %v1796_v17 = vpop.f32.mrb[67].mxu1 }
 0x5db   : > { %v1797_v5 = vadd.f32 %v1796_v17, %v3636_v0 }
 0x5dc   : > { %1885 = vst [vmem:[%s3641_s4 + $0x10] sm:$0xff] %v1795_v15 }
 0x5dd   : > { %1886 = vst [vmem:[%s3641_s4 + $0x18] sm:$0xff] %v1797_v5  ;;  %v1800_v21 = vpop.f32.mrb[68].mxu1 }
 0x5de   : > { %v1801_v13 = vadd.f32 %v1800_v21, %v3633_v60  ;;  %v1802_v23 = vpop.f32.mrb[69].mxu1 }
 0x5df   : > { %v1803_v33 = vadd.f32 %v1802_v23, %v3636_v0 }
 0x5e0   : > { %1887 = vst [vmem:[%s3641_s4 + $0x20] sm:$0xff] %v1801_v13 }
 0x5e1   : > { %1888 = vst [vmem:[%s3641_s4 + $0x28] sm:$0xff] %v1803_v33  ;;  %v1806_v27 = vpop.f32.mrb[70].mxu1 }
 0x5e2   : > { %v1807_v29 = vadd.f32 %v1806_v27, %v3633_v60  ;;  %v1808_v40 = vpop.f32.mrb[71].mxu1 }
 0x5e3   : > { %v1809_v14 = vadd.f32 %v1808_v40, %v3636_v0 }
 0x5e4   : > { %1889 = vst [vmem:[%s3641_s4 + $0x30] sm:$0xff] %v1807_v29 }
 0x5e5   : > { %1890 = vst [vmem:[%s3641_s4 + $0x38] sm:$0xff] %v1809_v14  ;;  %v1812_v35 = vpop.f32.mrb[72].mxu1 }
 0x5e6   : > { %v1813_v59 = vadd.f32 %v1812_v35, %v3633_v60  ;;  %v1814_v61 = vpop.f32.mrb[73].mxu1 }
 0x5e7   : > { %v1815_v43 = vadd.f32 %v1814_v61, %v3636_v0 }
 0x5e8   : > { %1891 = vst [vmem:[%s3641_s4 + $0x40] sm:$0xff] %v1813_v59 }
 0x5e9   : > { %1892 = vst [vmem:[%s3641_s4 + $0x48] sm:$0xff] %v1815_v43  ;;  %v1818_v2 = vpop.f32.mrb[74].mxu1 }
 0x5ea   : > { %v1819_v55 = vadd.f32 %v1818_v2, %v3633_v60  ;;  %v1820_v28 = vpop.f32.mrb[75].mxu1 }
 0x5eb   : > { %v1821_v11 = vadd.f32 %v1820_v28, %v3636_v0 }
 0x5ec   : > { %1893 = vst [vmem:[%s3641_s4 + $0x50] sm:$0xff] %v1819_v55 }
 0x5ed   : > { %1894 = vst [vmem:[%s3641_s4 + $0x58] sm:$0xff] %v1821_v11  ;;  %v1824_v49 = vpop.f32.mrb[76].mxu1 }
 0x5ee   : > { %v1825_v20 = vadd.f32 %v1824_v49, %v3633_v60  ;;  %v1826_v10 = vpop.f32.mrb[77].mxu1 }
 0x5ef   : > { %v1827_v46 = vadd.f32 %v1826_v10, %v3636_v0 }
 0x5f0   : > { %1895 = vst [vmem:[%s3641_s4 + $0x60] sm:$0xff] %v1825_v20 }
 0x5f1   : > { %1896 = vst [vmem:[%s3641_s4 + $0x68] sm:$0xff] %v1827_v46  ;;  %v1830_v9 = vpop.f32.mrb[78].mxu1 }
 0x5f2   : > { %v1831_v41 = vadd.f32 %v1830_v9, %v3633_v60  ;;  %v1832_v16 = vpop.f32.mrb[79].mxu1 }
 0x5f3   : > { %v1833_v36 = vadd.f32 %v1832_v16, %v3636_v0 }
 0x5f4   : > { %1897 = vst [vmem:[%s3641_s4 + $0x70] sm:$0xff] %v1831_v41 }
 0x5f5   : > { %1898 = vst [vmem:[%s3641_s4 + $0x78] sm:$0xff] %v1833_v36  ;;  %v1836_v45 = vpop.f32.mrb[80].mxu1 }
 0x5f6   : > { %v1837_v7 = vadd.f32 %v1836_v45, %v3633_v60  ;;  %v1838_v38 = vpop.f32.mrb[81].mxu1 }
 0x5f7   : > { %v1839_v25 = vadd.f32 %v1838_v38, %v3636_v0 }
 0x5f8   : > { %1899 = vst [vmem:[%s3641_s4 + $0x80] sm:$0xff] %v1837_v7 }
 0x5f9   : > { %1900 = vst [vmem:[%s3641_s4 + $0x88] sm:$0xff] %v1839_v25  ;;  %v1842_v34 = vpop.f32.mrb[82].mxu1 }
 0x5fa   : > { %v1843_v1 = vadd.f32 %v1842_v34, %v3633_v60  ;;  %v1844_v47 = vpop.f32.mrb[83].mxu1 }
 0x5fb   : > { %v1845_v24 = vadd.f32 %v1844_v47, %v3636_v0 }
 0x5fc   : > { %1901 = vst [vmem:[%s3641_s4 + $0x90] sm:$0xff] %v1843_v1 }
 0x5fd   : > { %1902 = vst [vmem:[%s3641_s4 + $0x98] sm:$0xff] %v1845_v24  ;;  %v1848_v6 = vpop.f32.mrb[84].mxu1 }
 0x5fe   : > { %v1849_v31 = vadd.f32 %v1848_v6, %v3633_v60  ;;  %v1850_v50 = vpop.f32.mrb[85].mxu1 }
 0x5ff   : > { %v1851_v26 = vadd.f32 %v1850_v50, %v3636_v0 }
 0x600   : > { %1903 = vst [vmem:[%s3641_s4 + $0xa0] sm:$0xff] %v1849_v31 }
 0x601   : > { %1904 = vst [vmem:[%s3641_s4 + $0xa8] sm:$0xff] %v1851_v26  ;;  %v1854_v22 = vpop.f32.mrb[86].mxu1 }
 0x602   : > { %v1855_v51 = vadd.f32 %v1854_v22, %v3633_v60  ;;  %v1856_v54 = vpop.f32.mrb[87].mxu1 }
 0x603   : > { %v1857_v53 = vadd.f32 %v1856_v54, %v3636_v0 }
 0x604   : > { %1905 = vst [vmem:[%s3641_s4 + $0xb0] sm:$0xff] %v1855_v51 }
 0x605   : > { %1906 = vst [vmem:[%s3641_s4 + $0xb8] sm:$0xff] %v1857_v53  ;;  %v1860_v32 = vpop.f32.mrb[88].mxu1 }
 0x606   : > { %v1861_v30 = vadd.f32 %v1860_v32, %v3633_v60  ;;  %v1862_v62 = vpop.f32.mrb[89].mxu1 }
 0x607   : > { %v1863_v37 = vadd.f32 %v1862_v62, %v3636_v0 }
 0x608   : > { %1907 = vst [vmem:[%s3641_s4 + $0xc0] sm:$0xff] %v1861_v30 }
 0x609   : > { %1908 = vst [vmem:[%s3641_s4 + $0xc8] sm:$0xff] %v1863_v37  ;;  %v1866_v19 = vpop.f32.mrb[90].mxu1 }
 0x60a   : > { %v1867_v39 = vadd.f32 %v1866_v19, %v3633_v60  ;;  %v1868_v44 = vpop.f32.mrb[91].mxu1 }
 0x60b   : > { %v1869_v48 = vadd.f32 %v1868_v44, %v3636_v0 }
 0x60c   : > { %1909 = vst [vmem:[%s3641_s4 + $0xd0] sm:$0xff] %v1867_v39 }
 0x60d   : > { %1910 = vst [vmem:[%s3641_s4 + $0xd8] sm:$0xff] %v1869_v48  ;;  %v1872_v58 = vpop.f32.mrb[92].mxu1 }
 0x60e   : > { %v1873_v52 = vadd.f32 %v1872_v58, %v3633_v60  ;;  %v1874_v56 = vpop.f32.mrb[93].mxu1 }
 0x60f   : > { %v1875_v63 = vadd.f32 %v1874_v56, %v3636_v0 }
 0x610   : > { %1911 = vst [vmem:[%s3641_s4 + $0xe0] sm:$0xff] %v1873_v52 }
 0x611   : > { %1912 = vst [vmem:[%s3641_s4 + $0xe8] sm:$0xff] %v1875_v63  ;;  %v1878_v42 = vpop.f32.mrb[94].mxu1 }
 0x612   : > { %v1879_v3 = vadd.f32 %v1878_v42, %v3633_v60  ;;  %v1880_v4 = vpop.f32.mrb[95].mxu1 }
 0x613   : > { %v1881_v8 = vadd.f32 %v1880_v4, %v3636_v0 }
 0x614   : > { %1913 = vst [vmem:[%s3641_s4 + $0xf0] sm:$0xff] %v1879_v3 }
 0x615   : > { %1914 = vst [vmem:[%s3641_s4 + $0xf8] sm:$0xff] %v1881_v8 }
 0x616   : > { %2710 = shalt.err (!%p2707_p3)
}
 0x617   : > { %s2711_s13 = scalar_lea.hbm %s3707_s18, 4096  ;;  %s2715_s11 = scalar_lea.hbm %s3764_s8, 8192 }
 0x618   : > { %p2712_p9 = scmp.ne.s32.totalorder %s3707_s18, %s2711_s13  ;;  %p2716_p7 = scmp.lt.u32.totalorder %s3707_s18, %s3764_s8 }
 0x619   : > { %p2717_p12 = scmp.lt.u32.totalorder %s2715_s11, %s2711_s13  ;;  %p2719_p2 = scmp.lt.u32.totalorder %s2711_s13, %s3707_s18 }
 0x61a   : > { %p2713_p13 = pnand %p2712_p9, %p2983_p5 }
 0x61b   : > { %p2718_p1 = por %p2717_p12, %p2716_p7 }
 0x61c   : > { %p2714_p11 = pneg %p2713_p13 }
 0x61d   : > { %p2720_p4 = por %p2719_p2, %p2718_p1 }
 0x61f   : > { %p2721_p0 = pnand %p2720_p4, %p2714_p11 }
 0x621   : > { %2724 = shalt.err (!%p2721_p0)
}
 0x622   : > { %s2788_s24 = smov 256   ;;  %s2789_s15 = smov 16  }
 0x623   : > { %2416 = dma.vmem_to_hbm [thread:$0]  (%p2983_p5), %s3709_s29, 4096, %s3707_s18, %s1916_s9, %s2788_s24, %s2788_s24, %s2789_s15  }
 0x624 PF: > { %s3830_s20 = sld [smem:[#allocation17_spill]]  ;;  %s3831_s4 = sld [smem:[#allocation19_spill]] }
 0x625   : > { %p3833_p6 = scmp.ge.s32.totalorder %s2775_s30, 2 }
 0x62a   : > { %s1944_s21 = sand.u32 1, %s3830_s20   ;;  %p3832_p8 = scmp.ne.s32.totalorder %s3831_s4, 0 }
 0x62b   : > { %s1945_s22 = scalar_lea.sflag [#allocation4], %s1944_s21 }
 0x62c   : > { %p2436_p10 = pnand %p3833_p6, %p3832_p8 }
 0x62e   : > { %2758 = dma.done.wait (!%p2436_p10), %s1945_s22, 4096  }
 0x62f   : > { %2760 = vsyncadd (!%p2436_p10), %s1945_s22, 4294963200  ;;  %s3834_s10 = sld [smem:[#allocation18_spill]]  ;;  %s3835_s29 = sld [smem:[#allocation20_spill]] }
 0x630   : > { %p25_p3 = scmp.ge.s32.totalorder %s2948_s25, 4   ;;  %s3836_s27 = smov %s2767_s28 }
 0x631   : > { %s3838_s30 = smov %s2948_s25 }
 0x632   :  { %27 = sbr.rel (!%p25_p3) target bundleno = 12 (0xc), region = 122 }
 0x635   : > { %s3837_s28 = smov %s3834_s10 }
 0x639   :  { %1950 = vsyncpa [#allocation3], 1 }
 0x63a   :  { %1952 = vsyncpa [#allocation3 + $0x1], 1 }
 0x63b   :  { %1953 = vsyncpa [#allocation6], 1 }
 0x63c   :  { %1955 = vsyncpa [#allocation6 + $0x1], 1 }
 0x63d   :  { %1956 = vsyncpa [#allocation9], 1 }
 0x63e   :  { %1957 = vsyncpa [#allocation4], 1 }
 0x63f   :  { %1959 = vsyncpa [#allocation4 + $0x1], 1 }

</bundles_post_ra>
